<compile_context>
chip_gen: v7x
topology: tpu7x:2x2x1
jax: 0.10.0
libtpu: 0.0.40
codegen_flags: <defaults>
</compile_context>

<pallas_src>
import functools

import jax
import jax.numpy as jnp
from jax.experimental import pallas as pl
from jax.experimental.pallas import tpu as pltpu

LN_EPS = 1e-5
VMEM_LIMIT = 48 * 1024 * 1024  # explicit, with headroom even on v7x (64 MiB)


# ------------------------------ tile selection ------------------------------

def _pick_tile(dim, preferred):
    """Largest of {preferred, 512, 256, 128} that divides `dim`, else full dim.

    All candidates are multiples of (8, 128); the full-dim fallback uses the
    "block equals full array dim" exception (needed for the tiny demo shapes).
    """
    for t in (preferred, 512, 256, 128):
        if t <= dim and dim % t == 0:
            return t
    return dim


# ------------------------------ fused linear --------------------------------

def _make_linear_kernel(*, nk, has_ln, has_res, activation):
    """Tiled matmul kernel with optional fused LayerNorm (on the input rows),
    quick-gelu activation and residual add in the epilogue."""

    def kernel(*refs):
        it = iter(refs)
        x_ref = next(it)
        if has_ln:
            g_ref = next(it)
            bln_ref = next(it)
        w_ref = next(it)
        bias_ref = next(it)
        res_ref = next(it) if has_res else None
        o_ref = next(it)
        acc_ref = next(it) if nk > 1 else None

        x = x_ref[...]
        if has_ln:
            # LayerNorm in f32 over the full K row (K is not tiled here).
            xf = x.astype(jnp.float32)
            mu = jnp.mean(xf, axis=-1, keepdims=True)
            var = jnp.mean(jnp.square(xf - mu), axis=-1, keepdims=True)
            xf = (xf - mu) * jax.lax.rsqrt(var + LN_EPS)
            xf = xf * g_ref[...] + bln_ref[...]
            x = xf.astype(w_ref.dtype)

        part = jnp.dot(x, w_ref[...], preferred_element_type=jnp.float32)

        def _finish(acc):
            y = acc + bias_ref[...]
            if activation == "quick_gelu":
                y = y * jax.nn.sigmoid(1.702 * y)
            if has_res:
                y = y + res_ref[...].astype(jnp.float32)
            o_ref[...] = y.astype(o_ref.dtype)

        if nk == 1:
            _finish(part)
        else:
            kk = pl.program_id(2)

            @pl.when(kk == 0)
            def _():
                acc_ref[...] = jnp.zeros_like(acc_ref)

            acc_ref[...] += part

            @pl.when(kk == nk - 1)
            def _():
                _finish(acc_ref[...])

    return kernel


def fused_linear(x, w, b, *, ln=None, residual=None, activation=None,
                 tm=256, tn=256, tk=512):
    """y = [residual +] act( [LN(x)] @ w + b ), tiled over (M, N, K).

    x: (M, K) bf16, w: (K, N) bf16, b: (N,) f32,
    ln: optional (gamma, beta) each (K,)  -> forces K untiled (tk = K),
    residual: optional (M, N) bf16 added in the epilogue.
    """
    M, K = x.shape
    K2, N = w.shape
    assert K == K2

    tm = _pick_tile(M, tm)
    tn = _pick_tile(N, tn)
    tk = K if ln is not None else _pick_tile(K, tk)
    ni, nj, nk = M // tm, N // tn, K // tk

    has_ln = ln is not None
    has_res = residual is not None
    kernel = _make_linear_kernel(nk=nk, has_ln=has_ln, has_res=has_res,
                                 activation=activation)

    in_specs = [pl.BlockSpec((tm, tk), lambda i, j, k: (i, k))]
    inputs = [x]
    if has_ln:
        gamma, beta = ln
        in_specs += [pl.BlockSpec((1, tk), lambda i, j, k: (0, 0)),
                     pl.BlockSpec((1, tk), lambda i, j, k: (0, 0))]
        inputs += [gamma.reshape(1, K).astype(jnp.float32),
                   beta.reshape(1, K).astype(jnp.float32)]
    in_specs += [pl.BlockSpec((tk, tn), lambda i, j, k: (k, j)),
                 pl.BlockSpec((1, tn), lambda i, j, k: (0, j))]
    inputs += [w, b.reshape(1, N).astype(jnp.float32)]
    if has_res:
        in_specs += [pl.BlockSpec((tm, tn), lambda i, j, k: (i, j))]
        inputs += [residual]

    scratch = [pltpu.VMEM((tm, tn), jnp.float32)] if nk > 1 else []

    return pl.pallas_call(
        kernel,
        out_shape=jax.ShapeDtypeStruct((M, N), jnp.bfloat16),
        grid=(ni, nj, nk),
        in_specs=in_specs,
        out_specs=pl.BlockSpec((tm, tn), lambda i, j, k: (i, j)),
        scratch_shapes=scratch,
        compiler_params=pltpu.CompilerParams(
            dimension_semantics=("parallel", "parallel", "arbitrary"),
            vmem_limit_bytes=VMEM_LIMIT),
    )(*inputs)


# ------------------------------- layernorm -----------------------------------

def _layernorm_kernel(x_ref, g_ref, b_ref, o_ref):
    x = x_ref[...].astype(jnp.float32)
    mu = jnp.mean(x, axis=-1, keepdims=True)
    var = jnp.mean(jnp.square(x - mu), axis=-1, keepdims=True)
    y = (x - mu) * jax.lax.rsqrt(var + LN_EPS) * g_ref[...] + b_ref[...]
    o_ref[...] = y.astype(o_ref.dtype)


def pallas_layernorm(x, gamma, beta, tm=256):
    M, D = x.shape
    tm = _pick_tile(M, tm)
    return pl.pallas_call(
        _layernorm_kernel,
        out_shape=jax.ShapeDtypeStruct((M, D), jnp.bfloat16),
        grid=(M // tm,),
        in_specs=[pl.BlockSpec((tm, D), lambda i: (i, 0)),
                  pl.BlockSpec((1, D), lambda i: (0, 0)),
                  pl.BlockSpec((1, D), lambda i: (0, 0))],
        out_specs=pl.BlockSpec((tm, D), lambda i: (i, 0)),
        compiler_params=pltpu.CompilerParams(
            dimension_semantics=("parallel",)),
    )(x, gamma.reshape(1, D).astype(jnp.float32),
      beta.reshape(1, D).astype(jnp.float32))


# -------------------------------- attention ----------------------------------

def _make_attn_kernel(*, hg, hd, scale):
    def kernel(q_ref, k_ref, v_ref, o_ref):
        qb = q_ref[0]                 # (S, hg*hd) bf16
        kb = k_ref[0]
        vb = v_ref[0]
        outs = []
        for h in range(hg):           # static unroll over heads in the group
            sl = slice(h * hd, (h + 1) * hd)
            # q @ k^T without any transpose: contract dim 1 of both operands.
            s = jax.lax.dot_general(
                qb[:, sl], kb[:, sl], (((1,), (1,)), ((), ())),
                preferred_element_type=jnp.float32) * scale
            s = s - jnp.max(s, axis=-1, keepdims=True)
            p = jnp.exp(s)
            p = p * pl.reciprocal(jnp.sum(p, axis=-1, keepdims=True),
                                  approx=True)
            outs.append(jnp.dot(p.astype(vb.dtype), vb[:, sl],
                                preferred_element_type=jnp.float32))
        out = outs[0] if hg == 1 else jnp.concatenate(outs, axis=-1)
        o_ref[0] = out.astype(o_ref.dtype)   # lane-dense store (hg*hd wide)
    return kernel


def pallas_attention(qkv, B, S, D, nh, scale):
    """Multi-head attention reading head blocks straight out of the fused
    (B, S, 3D) QKV tensor; output is (B, S, D) in standard concat-head layout
    so it feeds the Wo matmul with no transposes."""
    hd = D // nh
    if D % 128 == 0 and 128 % hd == 0:
        hgw = 128                      # >=128-lane head group (e.g. 2 heads of 64)
    else:
        hgw = D                        # tiny / odd hidden sizes: all heads at once
    hg = hgw // hd
    G = D // hgw

    qkv3 = qkv.reshape(B, S, 3 * D)
    if hgw == D and D % 128 != 0:
        # Fallback for non-128-multiple D: lane blocks must be full-width, so
        # split q/k/v once in the wrapper (only hit at toy sizes).
        q = qkv3[..., :D]
        k = qkv3[..., D:2 * D]
        v = qkv3[..., 2 * D:]
        inputs = (q, k, v)
        in_specs = [pl.BlockSpec((1, S, D), lambda b, g: (b, 0, 0))
                    for _ in range(3)]
    else:
        inputs = (qkv3, qkv3, qkv3)
        in_specs = [
            pl.BlockSpec((1, S, hgw), lambda b, g: (b, 0, g)),
            pl.BlockSpec((1, S, hgw), lambda b, g: (b, 0, G + g)),
            pl.BlockSpec((1, S, hgw), lambda b, g: (b, 0, 2 * G + g)),
        ]

    kernel = _make_attn_kernel(hg=hg, hd=hd, scale=scale)
    return pl.pallas_call(
        kernel,
        out_shape=jax.ShapeDtypeStruct((B, S, D), jnp.bfloat16),
        grid=(B, G),
        in_specs=in_specs,
        out_specs=pl.BlockSpec((1, S, hgw), lambda b, g: (b, 0, g)),
        compiler_params=pltpu.CompilerParams(
            dimension_semantics=("parallel", "parallel"),
            vmem_limit_bytes=VMEM_LIMIT),
    )(*inputs)
    # TODO(synk): for very long sequences switch this to an online-softmax
    # (flash) variant so the SxS score tile never exceeds the v7x VMEM budget.


# ----------------------------- model definition ------------------------------

def init_params(key, cfg):
    D = cfg["hidden_size"]
    I = cfg["intermediate_size"]
    P = cfg["patch_size"]
    L = cfg["num_hidden_layers"]
    num_positions = (cfg["image_size"] // P) ** 2 + 1

    keys = iter(jax.random.split(key, 16 * (L + 2)))

    def rnd(shape, scale=0.02, dtype=jnp.bfloat16):
        return (scale * jax.random.normal(next(keys), shape, jnp.float32)
                ).astype(dtype)

    params = {
        "class_embedding": rnd((D,), 1.0),
        "patch_w": rnd((3 * P * P, D)),          # Conv2d (stride==kernel) weight
        "pos_emb": rnd((num_positions, D)),
        "pre_ln_g": jnp.ones((D,), jnp.float32),
        "pre_ln_b": jnp.zeros((D,), jnp.float32),
        "post_ln_g": jnp.ones((D,), jnp.float32),
        "post_ln_b": jnp.zeros((D,), jnp.float32),
        "layers": [],
    }
    for _ in range(L):
        params["layers"].append({
            "ln1_g": jnp.ones((D,), jnp.float32), "ln1_b": jnp.zeros((D,), jnp.float32),
            "ln2_g": jnp.ones((D,), jnp.float32), "ln2_b": jnp.zeros((D,), jnp.float32),
            # fused Q/K/V projection
            "wqkv": rnd((D, 3 * D)), "bqkv": rnd((3 * D,), dtype=jnp.float32),
            "wo": rnd((D, D)), "bo": rnd((D,), dtype=jnp.float32),
            "w1": rnd((D, I)), "b1": rnd((I,), dtype=jnp.float32),
            "w2": rnd((I, D)), "b2": rnd((D,), dtype=jnp.float32),
        })
    return params


def clip_vision_forward(params, pixel_values, cfg):
    B, C, H, W = pixel_values.shape
    P = cfg["patch_size"]
    D = cfg["hidden_size"]
    nh = cfg["num_attention_heads"]
    hd = D // nh
    gh, gw = H // P, W // P
    S = gh * gw + 1

    # --- embeddings: stride==kernel Conv2d (no bias) == per-patch matmul ---
    x = pixel_values.astype(jnp.bfloat16)
    x = x.reshape(B, C, gh, P, gw, P).transpose(0, 2, 4, 1, 3, 5)
    x = x.reshape(B * gh * gw, C * P * P)
    patch = fused_linear(x, params["patch_w"], jnp.zeros((D,), jnp.float32))
    patch = patch.reshape(B, gh * gw, D)

    cls = jnp.broadcast_to(params["class_embedding"][None, None, :], (B, 1, D))
    h = jnp.concatenate([cls, patch], axis=1) + params["pos_emb"][None, :, :]

    # --- pre_layrnorm (standalone: its output is the residual stream) ---
    h2 = pallas_layernorm(h.reshape(B * S, D),
                          params["pre_ln_g"], params["pre_ln_b"])

    scale = hd ** -0.5

    # --- encoder layers ---
    for layer in params["layers"]:
        # LN1 fused into the QKV matmul; single (D, 3D) projection.
        qkv = fused_linear(h2, layer["wqkv"], layer["bqkv"],
                           ln=(layer["ln1_g"], layer["ln1_b"]))
        attn = pallas_attention(qkv, B, S, D, nh, scale)        # (B, S, D)
        # residual fused into the output projection epilogue
        h2 = fused_linear(attn.reshape(B * S, D), layer["wo"], layer["bo"],
                          residual=h2)
        # LN2 + quick-gelu fused into the W1 matmul
        ff = fused_linear(h2, layer["w1"], layer["b1"],
                          ln=(layer["ln2_g"], layer["ln2_b"]),
                          activation="quick_gelu")
        # residual fused into the W2 epilogue
        h2 = fused_linear(ff, layer["w2"], layer["b2"], residual=h2)

    last_hidden = h2.reshape(B, S, D)

    # --- pooled output: CLS token + post_layernorm (tiny -> plain JAX) ---
    pooled = last_hidden[:, 0, :].astype(jnp.float32)
    mu = jnp.mean(pooled, axis=-1, keepdims=True)
    var = jnp.mean(jnp.square(pooled - mu), axis=-1, keepdims=True)
    pooled = ((pooled - mu) * jax.lax.rsqrt(var + LN_EPS)
              * params["post_ln_g"] + params["post_ln_b"])
    return last_hidden, pooled


def averager_forward(params, x, cfg):
    """Averager.forward: x (B, T, C, H, W) -> pooled image embedding (B, T, D)."""
    lead = x.shape[:2]
    frames = x.reshape((-1,) + x.shape[-3:])               # (B*T, C, H, W)
    _, pooled = clip_vision_forward(params, frames, cfg)   # (B*T, D)
    return pooled.reshape(lead + (-1,))


# ----------------------------------- main ------------------------------------

if __name__ == "__main__":
    cfg = {
        "hidden_size": 32,
        "intermediate_size": 64,
        "num_attention_heads": 4,
        "num_hidden_layers": 2,
        "image_size": 16,
        "patch_size": 8,
    }

    key = jax.random.PRNGKey(0)
    k_params, k_input = jax.random.split(key)
    params = init_params(k_params, cfg)

    # Averager input: (batch, time, C, H, W)
    x = jax.random.normal(k_input, (2, 2, 3, 16, 16), jnp.float32)

    fwd = jax.jit(functools.partial(averager_forward, cfg=cfg))
    out = fwd(params, x)
    jax.block_until_ready(out)

    assert out.shape == (2, 2, cfg["hidden_size"]), out.shape
    assert bool(jnp.all(jnp.isfinite(out)))

    print("KERNEL_OK")
</pallas_src>

<mosaic_0001>
module attributes {stable_mosaic.version = 11 : i64} {
  func.func @kernel(%arg0: i32, %arg1: i32, %arg2: i32, %arg3: memref<16x192xbf16, #tpu.memory_space<vmem>>, %arg4: memref<192x32xbf16, #tpu.memory_space<vmem>>, %arg5: memref<1x32xf32, #tpu.memory_space<vmem>>, %arg6: memref<16x32xbf16, #tpu.memory_space<vmem>>) attributes {dimension_semantics = [#tpu.dimension_semantics<parallel>, #tpu.dimension_semantics<parallel>, #tpu.dimension_semantics<arbitrary>], iteration_bounds = array<i64: 1, 1, 1>, scalar_prefetch = 0 : i64, scratch_operands = 0 : i64, tpu.core_type = #tpu.core_type<tc>, window_params = [{transform_indices = @transform_0, window_bounds = array<i64: 16, 192>}, {transform_indices = @transform_1, window_bounds = array<i64: 192, 32>}, {transform_indices = @transform_2, window_bounds = array<i64: 1, 32>}, {transform_indices = @transform_3, window_bounds = array<i64: 16, 32>}]} {
    %c0 = arith.constant 0 : index
    %c0_0 = arith.constant 0 : index
    %0 = vector.load %arg3[%c0, %c0_0] : memref<16x192xbf16, #tpu.memory_space<vmem>>, vector<16x192xbf16>
    %c0_1 = arith.constant 0 : index
    %c0_2 = arith.constant 0 : index
    %1 = vector.load %arg4[%c0_1, %c0_2] : memref<192x32xbf16, #tpu.memory_space<vmem>>, vector<192x32xbf16>
    %cst = arith.constant dense<0.000000e+00> : vector<16x32xf32>
    %2 = tpu.matmul %0, %1, %cst {dimension_numbers = #tpu.dot_dimension_numbers<[1], [0], [0], [1], [0, 0, 1, 1], [], []>} : vector<16x192xbf16>, vector<192x32xbf16>, vector<16x32xf32> -> vector<16x32xf32>
    %c0_3 = arith.constant 0 : index
    %c0_4 = arith.constant 0 : index
    %3 = vector.load %arg5[%c0_3, %c0_4] : memref<1x32xf32, #tpu.memory_space<vmem>>, vector<1x32xf32>
    %4 = vector.broadcast %3 : vector<1x32xf32> to vector<16x32xf32>
    %5 = arith.addf %2, %4 : vector<16x32xf32>
    %6 = arith.truncf %5 : vector<16x32xf32> to vector<16x32xbf16>
    %c0_5 = arith.constant 0 : index
    %c0_6 = arith.constant 0 : index
    %7 = vector.load %arg6[%c0_5, %c0_6] : memref<16x32xbf16, #tpu.memory_space<vmem>>, vector<16x32xbf16>
    tpu.vector_store %arg6[%c0_5, %c0_6], %6 {strides = array<i32>} : memref<16x32xbf16, #tpu.memory_space<vmem>>, vector<16x32xbf16>,
    return
  }
  func.func @transform_0(%arg0: i32, %arg1: i32, %arg2: i32) -> (i32, i32) {
    %c0_i32 = arith.constant 0 : i32
    return %arg0, %arg2 : i32, i32
  }
  func.func @transform_1(%arg0: i32, %arg1: i32, %arg2: i32) -> (i32, i32) {
    %c0_i32 = arith.constant 0 : i32
    return %arg2, %arg1 : i32, i32
  }
  func.func @transform_2(%arg0: i32, %arg1: i32, %arg2: i32) -> (i32, i32) {
    %c0_i32 = arith.constant 0 : i32
    %c0_i32_0 = arith.constant 0 : i32
    return %c0_i32, %arg1 : i32, i32
  }
  func.func @transform_3(%arg0: i32, %arg1: i32, %arg2: i32) -> (i32, i32) {
    %c0_i32 = arith.constant 0 : i32
    return %arg0, %arg1 : i32, i32
  }
}

module attributes {stable_mosaic.version = 11 : i64} {
  func.func @_layernorm_kernel(%arg0: i32, %arg1: memref<20x32xbf16, #tpu.memory_space<vmem>>, %arg2: memref<1x32xf32, #tpu.memory_space<vmem>>, %arg3: memref<1x32xf32, #tpu.memory_space<vmem>>, %arg4: memref<20x32xbf16, #tpu.memory_space<vmem>>) attributes {dimension_semantics = [#tpu.dimension_semantics<parallel>], iteration_bounds = array<i64: 1>, scalar_prefetch = 0 : i64, scratch_operands = 0 : i64, tpu.core_type = #tpu.core_type<tc>, window_params = [{transform_indices = @transform_0, window_bounds = array<i64: 20, 32>}, {pipeline_mode = #tpu.pipeline_mode<synchronous>, transform_indices = @transform_1, window_bounds = array<i64: 1, 32>}, {pipeline_mode = #tpu.pipeline_mode<synchronous>, transform_indices = @transform_2, window_bounds = array<i64: 1, 32>}, {transform_indices = @transform_3, window_bounds = array<i64: 20, 32>}]} {
    %c0 = arith.constant 0 : index
    %c0_0 = arith.constant 0 : index
    %0 = vector.load %arg1[%c0, %c0_0] : memref<20x32xbf16, #tpu.memory_space<vmem>>, vector<20x32xbf16>
    %1 = arith.extf %0 : vector<20x32xbf16> to vector<20x32xf32>
    %cst = arith.constant dense<0.000000e+00> : vector<20xf32>
    %2 = vector.multi_reduction <add>, %1, %cst [1] : vector<20x32xf32> to vector<20xf32>
    %3 = vector.shape_cast %2 : vector<20xf32> to vector<20x1xf32>
    %cst_1 = arith.constant 3.200000e+01 : f32
    %4 = vector.broadcast %cst_1 : f32 to vector<20x1xf32>
    %5 = arith.divf %3, %4 : vector<20x1xf32>
    %6 = vector.broadcast %5 : vector<20x1xf32> to vector<20x32xf32>
    %7 = arith.subf %1, %6 : vector<20x32xf32>
    %8 = arith.mulf %7, %7 : vector<20x32xf32>
    %cst_2 = arith.constant dense<0.000000e+00> : vector<20xf32>
    %9 = vector.multi_reduction <add>, %8, %cst_2 [1] : vector<20x32xf32> to vector<20xf32>
    %10 = vector.shape_cast %9 : vector<20xf32> to vector<20x1xf32>
    %cst_3 = arith.constant 3.200000e+01 : f32
    %11 = vector.broadcast %cst_3 : f32 to vector<20x1xf32>
    %12 = arith.divf %10, %11 : vector<20x1xf32>
    %13 = vector.broadcast %5 : vector<20x1xf32> to vector<20x32xf32>
    %14 = arith.subf %1, %13 : vector<20x32xf32>
    %cst_4 = arith.constant 9.99999974E-6 : f32
    %15 = vector.broadcast %cst_4 : f32 to vector<20x1xf32>
    %16 = arith.addf %12, %15 : vector<20x1xf32>
    %17 = math.rsqrt %16 : vector<20x1xf32>
    %18 = vector.broadcast %17 : vector<20x1xf32> to vector<20x32xf32>
    %19 = arith.mulf %14, %18 : vector<20x32xf32>
    %c0_5 = arith.constant 0 : index
    %c0_6 = arith.constant 0 : index
    %20 = vector.load %arg2[%c0_5, %c0_6] : memref<1x32xf32, #tpu.memory_space<vmem>>, vector<1x32xf32>
    %21 = vector.broadcast %20 : vector<1x32xf32> to vector<20x32xf32>
    %22 = arith.mulf %19, %21 : vector<20x32xf32>
    %c0_7 = arith.constant 0 : index
    %c0_8 = arith.constant 0 : index
    %23 = vector.load %arg3[%c0_7, %c0_8] : memref<1x32xf32, #tpu.memory_space<vmem>>, vector<1x32xf32>
    %24 = vector.broadcast %23 : vector<1x32xf32> to vector<20x32xf32>
    %25 = arith.addf %22, %24 : vector<20x32xf32>
    %26 = arith.truncf %25 : vector<20x32xf32> to vector<20x32xbf16>
    %c0_9 = arith.constant 0 : index
    %c0_10 = arith.constant 0 : index
    %27 = vector.load %arg4[%c0_9, %c0_10] : memref<20x32xbf16, #tpu.memory_space<vmem>>, vector<20x32xbf16>
    tpu.vector_store %arg4[%c0_9, %c0_10], %26 {strides = array<i32>} : memref<20x32xbf16, #tpu.memory_space<vmem>>, vector<20x32xbf16>,
    return
  }
  func.func @transform_0(%arg0: i32) -> (i32, i32) {
    %c0_i32 = arith.constant 0 : i32
    %c0_i32_0 = arith.constant 0 : i32
    return %arg0, %c0_i32 : i32, i32
  }
  func.func @transform_1(%arg0: i32) -> (i32, i32) {
    %c0_i32 = arith.constant 0 : i32
    %c0_i32_0 = arith.constant 0 : i32
    %c0_i32_1 = arith.constant 0 : i32
    return %c0_i32, %c0_i32_0 : i32, i32
  }
  func.func @transform_2(%arg0: i32) -> (i32, i32) {
    %c0_i32 = arith.constant 0 : i32
    %c0_i32_0 = arith.constant 0 : i32
    %c0_i32_1 = arith.constant 0 : i32
    return %c0_i32, %c0_i32_0 : i32, i32
  }
  func.func @transform_3(%arg0: i32) -> (i32, i32) {
    %c0_i32 = arith.constant 0 : i32
    %c0_i32_0 = arith.constant 0 : i32
    return %arg0, %c0_i32 : i32, i32
  }
}

module attributes {stable_mosaic.version = 11 : i64} {
  func.func @kernel(%arg0: i32, %arg1: i32, %arg2: i32, %arg3: memref<20x32xbf16, #tpu.memory_space<vmem>>, %arg4: memref<1x32xf32, #tpu.memory_space<vmem>>, %arg5: memref<1x32xf32, #tpu.memory_space<vmem>>, %arg6: memref<32x96xbf16, #tpu.memory_space<vmem>>, %arg7: memref<1x96xf32, #tpu.memory_space<vmem>>, %arg8: memref<20x96xbf16, #tpu.memory_space<vmem>>) attributes {dimension_semantics = [#tpu.dimension_semantics<parallel>, #tpu.dimension_semantics<parallel>, #tpu.dimension_semantics<arbitrary>], iteration_bounds = array<i64: 1, 1, 1>, scalar_prefetch = 0 : i64, scratch_operands = 0 : i64, tpu.core_type = #tpu.core_type<tc>, window_params = [{transform_indices = @transform_0, window_bounds = array<i64: 20, 32>}, {pipeline_mode = #tpu.pipeline_mode<synchronous>, transform_indices = @transform_1, window_bounds = array<i64: 1, 32>}, {pipeline_mode = #tpu.pipeline_mode<synchronous>, transform_indices = @transform_2, window_bounds = array<i64: 1, 32>}, {transform_indices = @transform_3, window_bounds = array<i64: 32, 96>}, {transform_indices = @transform_4, window_bounds = array<i64: 1, 96>}, {transform_indices = @transform_5, window_bounds = array<i64: 20, 96>}]} {
    %c0 = arith.constant 0 : index
    %c0_0 = arith.constant 0 : index
    %0 = vector.load %arg3[%c0, %c0_0] : memref<20x32xbf16, #tpu.memory_space<vmem>>, vector<20x32xbf16>
    %1 = arith.extf %0 : vector<20x32xbf16> to vector<20x32xf32>
    %cst = arith.constant dense<0.000000e+00> : vector<20xf32>
    %2 = vector.multi_reduction <add>, %1, %cst [1] : vector<20x32xf32> to vector<20xf32>
    %3 = vector.shape_cast %2 : vector<20xf32> to vector<20x1xf32>
    %cst_1 = arith.constant 3.200000e+01 : f32
    %4 = vector.broadcast %cst_1 : f32 to vector<20x1xf32>
    %5 = arith.divf %3, %4 : vector<20x1xf32>
    %6 = vector.broadcast %5 : vector<20x1xf32> to vector<20x32xf32>
    %7 = arith.subf %1, %6 : vector<20x32xf32>
    %8 = arith.mulf %7, %7 : vector<20x32xf32>
    %cst_2 = arith.constant dense<0.000000e+00> : vector<20xf32>
    %9 = vector.multi_reduction <add>, %8, %cst_2 [1] : vector<20x32xf32> to vector<20xf32>
    %10 = vector.shape_cast %9 : vector<20xf32> to vector<20x1xf32>
    %cst_3 = arith.constant 3.200000e+01 : f32
    %11 = vector.broadcast %cst_3 : f32 to vector<20x1xf32>
    %12 = arith.divf %10, %11 : vector<20x1xf32>
    %13 = vector.broadcast %5 : vector<20x1xf32> to vector<20x32xf32>
    %14 = arith.subf %1, %13 : vector<20x32xf32>
    %cst_4 = arith.constant 9.99999974E-6 : f32
    %15 = vector.broadcast %cst_4 : f32 to vector<20x1xf32>
    %16 = arith.addf %12, %15 : vector<20x1xf32>
    %17 = math.rsqrt %16 : vector<20x1xf32>
    %18 = vector.broadcast %17 : vector<20x1xf32> to vector<20x32xf32>
    %19 = arith.mulf %14, %18 : vector<20x32xf32>
    %c0_5 = arith.constant 0 : index
    %c0_6 = arith.constant 0 : index
    %20 = vector.load %arg4[%c0_5, %c0_6] : memref<1x32xf32, #tpu.memory_space<vmem>>, vector<1x32xf32>
    %21 = vector.broadcast %20 : vector<1x32xf32> to vector<20x32xf32>
    %22 = arith.mulf %19, %21 : vector<20x32xf32>
    %c0_7 = arith.constant 0 : index
    %c0_8 = arith.constant 0 : index
    %23 = vector.load %arg5[%c0_7, %c0_8] : memref<1x32xf32, #tpu.memory_space<vmem>>, vector<1x32xf32>
    %24 = vector.broadcast %23 : vector<1x32xf32> to vector<20x32xf32>
    %25 = arith.addf %22, %24 : vector<20x32xf32>
    %26 = arith.truncf %25 : vector<20x32xf32> to vector<20x32xbf16>
    %c0_9 = arith.constant 0 : index
    %c0_10 = arith.constant 0 : index
    %27 = vector.load %arg6[%c0_9, %c0_10] : memref<32x96xbf16, #tpu.memory_space<vmem>>, vector<32x96xbf16>
    %cst_11 = arith.constant dense<0.000000e+00> : vector<20x96xf32>
    %28 = tpu.matmul %26, %27, %cst_11 {dimension_numbers = #tpu.dot_dimension_numbers<[1], [0], [0], [1], [0, 0, 1, 1], [], []>} : vector<20x32xbf16>, vector<32x96xbf16>, vector<20x96xf32> -> vector<20x96xf32>
    %c0_12 = arith.constant 0 : index
    %c0_13 = arith.constant 0 : index
    %29 = vector.load %arg7[%c0_12, %c0_13] : memref<1x96xf32, #tpu.memory_space<vmem>>, vector<1x96xf32>
    %30 = vector.broadcast %29 : vector<1x96xf32> to vector<20x96xf32>
    %31 = arith.addf %28, %30 : vector<20x96xf32>
    %32 = arith.truncf %31 : vector<20x96xf32> to vector<20x96xbf16>
    %c0_14 = arith.constant 0 : index
    %c0_15 = arith.constant 0 : index
    %33 = vector.load %arg8[%c0_14, %c0_15] : memref<20x96xbf16, #tpu.memory_space<vmem>>, vector<20x96xbf16>
    tpu.vector_store %arg8[%c0_14, %c0_15], %32 {strides = array<i32>} : memref<20x96xbf16, #tpu.memory_space<vmem>>, vector<20x96xbf16>,
    return
  }
  func.func @transform_0(%arg0: i32, %arg1: i32, %arg2: i32) -> (i32, i32) {
    %c0_i32 = arith.constant 0 : i32
    return %arg0, %arg2 : i32, i32
  }
  func.func @transform_1(%arg0: i32, %arg1: i32, %arg2: i32) -> (i32, i32) {
    %c0_i32 = arith.constant 0 : i32
    %c0_i32_0 = arith.constant 0 : i32
    %c0_i32_1 = arith.constant 0 : i32
    return %c0_i32, %c0_i32_0 : i32, i32
  }
  func.func @transform_2(%arg0: i32, %arg1: i32, %arg2: i32) -> (i32, i32) {
    %c0_i32 = arith.constant 0 : i32
    %c0_i32_0 = arith.constant 0 : i32
    %c0_i32_1 = arith.constant 0 : i32
    return %c0_i32, %c0_i32_0 : i32, i32
  }
  func.func @transform_3(%arg0: i32, %arg1: i32, %arg2: i32) -> (i32, i32) {
    %c0_i32 = arith.constant 0 : i32
    return %arg2, %arg1 : i32, i32
  }
  func.func @transform_4(%arg0: i32, %arg1: i32, %arg2: i32) -> (i32, i32) {
    %c0_i32 = arith.constant 0 : i32
    %c0_i32_0 = arith.constant 0 : i32
    return %c0_i32, %arg1 : i32, i32
  }
  func.func @transform_5(%arg0: i32, %arg1: i32, %arg2: i32) -> (i32, i32) {
    %c0_i32 = arith.constant 0 : i32
    return %arg0, %arg1 : i32, i32
  }
}

module attributes {stable_mosaic.version = 11 : i64} {
  func.func @kernel(%arg0: i32, %arg1: i32, %arg2: memref<1x5x32xbf16, #tpu.memory_space<vmem>>, %arg3: memref<1x5x32xbf16, #tpu.memory_space<vmem>>, %arg4: memref<1x5x32xbf16, #tpu.memory_space<vmem>>, %arg5: memref<1x5x32xbf16, #tpu.memory_space<vmem>>) attributes {dimension_semantics = [#tpu.dimension_semantics<parallel>, #tpu.dimension_semantics<parallel>], iteration_bounds = array<i64: 4, 1>, scalar_prefetch = 0 : i64, scratch_operands = 0 : i64, tpu.core_type = #tpu.core_type<tc>, window_params = [{transform_indices = @transform_0, window_bounds = array<i64: 1, 5, 32>}, {transform_indices = @transform_1, window_bounds = array<i64: 1, 5, 32>}, {transform_indices = @transform_2, window_bounds = array<i64: 1, 5, 32>}, {transform_indices = @transform_3, window_bounds = array<i64: 1, 5, 32>}]} {
    %c0 = arith.constant 0 : index
    %c0_0 = arith.constant 0 : index
    %c0_1 = arith.constant 0 : index
    %0 = vector.load %arg2[%c0, %c0_0, %c0_1] : memref<1x5x32xbf16, #tpu.memory_space<vmem>>, vector<1x5x32xbf16>
    %1 = vector.shape_cast %0 : vector<1x5x32xbf16> to vector<5x32xbf16>
    %c0_2 = arith.constant 0 : index
    %c0_3 = arith.constant 0 : index
    %c0_4 = arith.constant 0 : index
    %2 = vector.load %arg3[%c0_2, %c0_3, %c0_4] : memref<1x5x32xbf16, #tpu.memory_space<vmem>>, vector<1x5x32xbf16>
    %3 = vector.shape_cast %2 : vector<1x5x32xbf16> to vector<5x32xbf16>
    %c0_5 = arith.constant 0 : index
    %c0_6 = arith.constant 0 : index
    %c0_7 = arith.constant 0 : index
    %4 = vector.load %arg4[%c0_5, %c0_6, %c0_7] : memref<1x5x32xbf16, #tpu.memory_space<vmem>>, vector<1x5x32xbf16>
    %5 = vector.shape_cast %4 : vector<1x5x32xbf16> to vector<5x32xbf16>
    %6 = vector.extract_strided_slice %1 {offsets = [0, 0], sizes = [5, 8], strides = [1, 1]} : vector<5x32xbf16> to vector<5x8xbf16>
    %7 = vector.extract_strided_slice %3 {offsets = [0, 0], sizes = [5, 8], strides = [1, 1]} : vector<5x32xbf16> to vector<5x8xbf16>
    %cst = arith.constant dense<0.000000e+00> : vector<5x5xf32>
    %8 = tpu.matmul %6, %7, %cst {dimension_numbers = #tpu.dot_dimension_numbers<[1], [1], [0], [0], [0, 0, 1, 0], [], []>} : vector<5x8xbf16>, vector<5x8xbf16>, vector<5x5xf32> -> vector<5x5xf32>
    %cst_8 = arith.constant 0.353553385 : f32
    %9 = vector.broadcast %cst_8 : f32 to vector<5x5xf32>
    %10 = arith.mulf %8, %9 : vector<5x5xf32>
    %cst_9 = arith.constant dense<0xFF800000> : vector<5xf32>
    %11 = vector.multi_reduction <maximumf>, %10, %cst_9 [1] : vector<5x5xf32> to vector<5xf32>
    %12 = vector.shape_cast %11 : vector<5xf32> to vector<5x1xf32>
    %13 = vector.broadcast %12 : vector<5x1xf32> to vector<5x5xf32>
    %14 = arith.subf %10, %13 : vector<5x5xf32>
    %15 = math.exp %14 : vector<5x5xf32>
    %cst_10 = arith.constant dense<0.000000e+00> : vector<5xf32>
    %16 = vector.multi_reduction <add>, %15, %cst_10 [1] : vector<5x5xf32> to vector<5xf32>
    %17 = vector.shape_cast %16 : vector<5xf32> to vector<5x1xf32>
    %18 = tpu.reciprocal %17 {approx = true} : vector<5x1xf32> -> vector<5x1xf32>
    %19 = vector.broadcast %18 : vector<5x1xf32> to vector<5x5xf32>
    %20 = arith.mulf %15, %19 : vector<5x5xf32>
    %21 = arith.truncf %20 : vector<5x5xf32> to vector<5x5xbf16>
    %22 = vector.extract_strided_slice %5 {offsets = [0, 0], sizes = [5, 8], strides = [1, 1]} : vector<5x32xbf16> to vector<5x8xbf16>
    %cst_11 = arith.constant dense<0.000000e+00> : vector<5x8xf32>
    %23 = tpu.matmul %21, %22, %cst_11 {dimension_numbers = #tpu.dot_dimension_numbers<[1], [0], [0], [1], [0, 0, 1, 1], [], []>} : vector<5x5xbf16>, vector<5x8xbf16>, vector<5x8xf32> -> vector<5x8xf32>
    %24 = vector.extract_strided_slice %1 {offsets = [0, 8], sizes = [5, 8], strides = [1, 1]} : vector<5x32xbf16> to vector<5x8xbf16>
    %25 = vector.extract_strided_slice %3 {offsets = [0, 8], sizes = [5, 8], strides = [1, 1]} : vector<5x32xbf16> to vector<5x8xbf16>
    %cst_12 = arith.constant dense<0.000000e+00> : vector<5x5xf32>
    %26 = tpu.matmul %24, %25, %cst_12 {dimension_numbers = #tpu.dot_dimension_numbers<[1], [1], [0], [0], [0, 0, 1, 0], [], []>} : vector<5x8xbf16>, vector<5x8xbf16>, vector<5x5xf32> -> vector<5x5xf32>
    %cst_13 = arith.constant 0.353553385 : f32
    %27 = vector.broadcast %cst_13 : f32 to vector<5x5xf32>
    %28 = arith.mulf %26, %27 : vector<5x5xf32>
    %cst_14 = arith.constant dense<0xFF800000> : vector<5xf32>
    %29 = vector.multi_reduction <maximumf>, %28, %cst_14 [1] : vector<5x5xf32> to vector<5xf32>
    %30 = vector.shape_cast %29 : vector<5xf32> to vector<5x1xf32>
    %31 = vector.broadcast %30 : vector<5x1xf32> to vector<5x5xf32>
    %32 = arith.subf %28, %31 : vector<5x5xf32>
    %33 = math.exp %32 : vector<5x5xf32>
    %cst_15 = arith.constant dense<0.000000e+00> : vector<5xf32>
    %34 = vector.multi_reduction <add>, %33, %cst_15 [1] : vector<5x5xf32> to vector<5xf32>
    %35 = vector.shape_cast %34 : vector<5xf32> to vector<5x1xf32>
    %36 = tpu.reciprocal %35 {approx = true} : vector<5x1xf32> -> vector<5x1xf32>
    %37 = vector.broadcast %36 : vector<5x1xf32> to vector<5x5xf32>
    %38 = arith.mulf %33, %37 : vector<5x5xf32>
    %39 = arith.truncf %38 : vector<5x5xf32> to vector<5x5xbf16>
    %40 = vector.extract_strided_slice %5 {offsets = [0, 8], sizes = [5, 8], strides = [1, 1]} : vector<5x32xbf16> to vector<5x8xbf16>
    %cst_16 = arith.constant dense<0.000000e+00> : vector<5x8xf32>
    %41 = tpu.matmul %39, %40, %cst_16 {dimension_numbers = #tpu.dot_dimension_numbers<[1], [0], [0], [1], [0, 0, 1, 1], [], []>} : vector<5x5xbf16>, vector<5x8xbf16>, vector<5x8xf32> -> vector<5x8xf32>
    %42 = vector.extract_strided_slice %1 {offsets = [0, 16], sizes = [5, 8], strides = [1, 1]} : vector<5x32xbf16> to vector<5x8xbf16>
    %43 = vector.extract_strided_slice %3 {offsets = [0, 16], sizes = [5, 8], strides = [1, 1]} : vector<5x32xbf16> to vector<5x8xbf16>
    %cst_17 = arith.constant dense<0.000000e+00> : vector<5x5xf32>
    %44 = tpu.matmul %42, %43, %cst_17 {dimension_numbers = #tpu.dot_dimension_numbers<[1], [1], [0], [0], [0, 0, 1, 0], [], []>} : vector<5x8xbf16>, vector<5x8xbf16>, vector<5x5xf32> -> vector<5x5xf32>
    %cst_18 = arith.constant 0.353553385 : f32
    %45 = vector.broadcast %cst_18 : f32 to vector<5x5xf32>
    %46 = arith.mulf %44, %45 : vector<5x5xf32>
    %cst_19 = arith.constant dense<0xFF800000> : vector<5xf32>
    %47 = vector.multi_reduction <maximumf>, %46, %cst_19 [1] : vector<5x5xf32> to vector<5xf32>
    %48 = vector.shape_cast %47 : vector<5xf32> to vector<5x1xf32>
    %49 = vector.broadcast %48 : vector<5x1xf32> to vector<5x5xf32>
    %50 = arith.subf %46, %49 : vector<5x5xf32>
    %51 = math.exp %50 : vector<5x5xf32>
    %cst_20 = arith.constant dense<0.000000e+00> : vector<5xf32>
    %52 = vector.multi_reduction <add>, %51, %cst_20 [1] : vector<5x5xf32> to vector<5xf32>
    %53 = vector.shape_cast %52 : vector<5xf32> to vector<5x1xf32>
    %54 = tpu.reciprocal %53 {approx = true} : vector<5x1xf32> -> vector<5x1xf32>
    %55 = vector.broadcast %54 : vector<5x1xf32> to vector<5x5xf32>
    %56 = arith.mulf %51, %55 : vector<5x5xf32>
    %57 = arith.truncf %56 : vector<5x5xf32> to vector<5x5xbf16>
    %58 = vector.extract_strided_slice %5 {offsets = [0, 16], sizes = [5, 8], strides = [1, 1]} : vector<5x32xbf16> to vector<5x8xbf16>
    %cst_21 = arith.constant dense<0.000000e+00> : vector<5x8xf32>
    %59 = tpu.matmul %57, %58, %cst_21 {dimension_numbers = #tpu.dot_dimension_numbers<[1], [0], [0], [1], [0, 0, 1, 1], [], []>} : vector<5x5xbf16>, vector<5x8xbf16>, vector<5x8xf32> -> vector<5x8xf32>
    %60 = vector.extract_strided_slice %1 {offsets = [0, 24], sizes = [5, 8], strides = [1, 1]} : vector<5x32xbf16> to vector<5x8xbf16>
    %61 = vector.extract_strided_slice %3 {offsets = [0, 24], sizes = [5, 8], strides = [1, 1]} : vector<5x32xbf16> to vector<5x8xbf16>
    %cst_22 = arith.constant dense<0.000000e+00> : vector<5x5xf32>
    %62 = tpu.matmul %60, %61, %cst_22 {dimension_numbers = #tpu.dot_dimension_numbers<[1], [1], [0], [0], [0, 0, 1, 0], [], []>} : vector<5x8xbf16>, vector<5x8xbf16>, vector<5x5xf32> -> vector<5x5xf32>
    %cst_23 = arith.constant 0.353553385 : f32
    %63 = vector.broadcast %cst_23 : f32 to vector<5x5xf32>
    %64 = arith.mulf %62, %63 : vector<5x5xf32>
    %cst_24 = arith.constant dense<0xFF800000> : vector<5xf32>
    %65 = vector.multi_reduction <maximumf>, %64, %cst_24 [1] : vector<5x5xf32> to vector<5xf32>
    %66 = vector.shape_cast %65 : vector<5xf32> to vector<5x1xf32>
    %67 = vector.broadcast %66 : vector<5x1xf32> to vector<5x5xf32>
    %68 = arith.subf %64, %67 : vector<5x5xf32>
    %69 = math.exp %68 : vector<5x5xf32>
    %cst_25 = arith.constant dense<0.000000e+00> : vector<5xf32>
    %70 = vector.multi_reduction <add>, %69, %cst_25 [1] : vector<5x5xf32> to vector<5xf32>
    %71 = vector.shape_cast %70 : vector<5xf32> to vector<5x1xf32>
    %72 = tpu.reciprocal %71 {approx = true} : vector<5x1xf32> -> vector<5x1xf32>
    %73 = vector.broadcast %72 : vector<5x1xf32> to vector<5x5xf32>
    %74 = arith.mulf %69, %73 : vector<5x5xf32>
    %75 = arith.truncf %74 : vector<5x5xf32> to vector<5x5xbf16>
    %76 = vector.extract_strided_slice %5 {offsets = [0, 24], sizes = [5, 8], strides = [1, 1]} : vector<5x32xbf16> to vector<5x8xbf16>
    %cst_26 = arith.constant dense<0.000000e+00> : vector<5x8xf32>
    %77 = tpu.matmul %75, %76, %cst_26 {dimension_numbers = #tpu.dot_dimension_numbers<[1], [0], [0], [1], [0, 0, 1, 1], [], []>} : vector<5x5xbf16>, vector<5x8xbf16>, vector<5x8xf32> -> vector<5x8xf32>
    %78 = tpu.concatenate %23, %41, %59, %77 in 1 : vector<5x8xf32>, vector<5x8xf32>, vector<5x8xf32>, vector<5x8xf32> -> vector<5x32xf32>
    %79 = arith.truncf %78 : vector<5x32xf32> to vector<5x32xbf16>
    %c0_27 = arith.constant 0 : index
    %c0_28 = arith.constant 0 : index
    %c0_29 = arith.constant 0 : index
    %80 = vector.load %arg5[%c0_27, %c0_28, %c0_29] : memref<1x5x32xbf16, #tpu.memory_space<vmem>>, vector<1x5x32xbf16>
    %81 = vector.shape_cast %80 : vector<1x5x32xbf16> to vector<5x32xbf16>
    %82 = vector.shape_cast %79 : vector<5x32xbf16> to vector<1x5x32xbf16>
    tpu.vector_store %arg5[%c0_27, %c0_28, %c0_29], %82 {strides = array<i32>} : memref<1x5x32xbf16, #tpu.memory_space<vmem>>, vector<1x5x32xbf16>,
    return
  }
  func.func @transform_0(%arg0: i32, %arg1: i32) -> (i32, i32, i32) {
    %c0_i32 = arith.constant 0 : i32
    %c0_i32_0 = arith.constant 0 : i32
    %c0_i32_1 = arith.constant 0 : i32
    return %arg0, %c0_i32, %c0_i32_0 : i32, i32, i32
  }
  func.func @transform_1(%arg0: i32, %arg1: i32) -> (i32, i32, i32) {
    %c0_i32 = arith.constant 0 : i32
    %c0_i32_0 = arith.constant 0 : i32
    %c0_i32_1 = arith.constant 0 : i32
    return %arg0, %c0_i32, %c0_i32_0 : i32, i32, i32
  }
  func.func @transform_2(%arg0: i32, %arg1: i32) -> (i32, i32, i32) {
    %c0_i32 = arith.constant 0 : i32
    %c0_i32_0 = arith.constant 0 : i32
    %c0_i32_1 = arith.constant 0 : i32
    return %arg0, %c0_i32, %c0_i32_0 : i32, i32, i32
  }
  func.func @transform_3(%arg0: i32, %arg1: i32) -> (i32, i32, i32) {
    %c0_i32 = arith.constant 0 : i32
    %c0_i32_0 = arith.constant 0 : i32
    return %arg0, %c0_i32, %arg1 : i32, i32, i32
  }
}

module attributes {stable_mosaic.version = 11 : i64} {
  func.func @kernel(%arg0: i32, %arg1: i32, %arg2: i32, %arg3: memref<20x32xbf16, #tpu.memory_space<vmem>>, %arg4: memref<32x32xbf16, #tpu.memory_space<vmem>>, %arg5: memref<1x32xf32, #tpu.memory_space<vmem>>, %arg6: memref<20x32xbf16, #tpu.memory_space<vmem>>, %arg7: memref<20x32xbf16, #tpu.memory_space<vmem>>) attributes {dimension_semantics = [#tpu.dimension_semantics<parallel>, #tpu.dimension_semantics<parallel>, #tpu.dimension_semantics<arbitrary>], iteration_bounds = array<i64: 1, 1, 1>, scalar_prefetch = 0 : i64, scratch_operands = 0 : i64, tpu.core_type = #tpu.core_type<tc>, window_params = [{transform_indices = @transform_0, window_bounds = array<i64: 20, 32>}, {transform_indices = @transform_1, window_bounds = array<i64: 32, 32>}, {transform_indices = @transform_2, window_bounds = array<i64: 1, 32>}, {transform_indices = @transform_3, window_bounds = array<i64: 20, 32>}, {transform_indices = @transform_4, window_bounds = array<i64: 20, 32>}]} {
    %c0 = arith.constant 0 : index
    %c0_0 = arith.constant 0 : index
    %0 = vector.load %arg3[%c0, %c0_0] : memref<20x32xbf16, #tpu.memory_space<vmem>>, vector<20x32xbf16>
    %c0_1 = arith.constant 0 : index
    %c0_2 = arith.constant 0 : index
    %1 = vector.load %arg4[%c0_1, %c0_2] : memref<32x32xbf16, #tpu.memory_space<vmem>>, vector<32x32xbf16>
    %cst = arith.constant dense<0.000000e+00> : vector<20x32xf32>
    %2 = tpu.matmul %0, %1, %cst {dimension_numbers = #tpu.dot_dimension_numbers<[1], [0], [0], [1], [0, 0, 1, 1], [], []>} : vector<20x32xbf16>, vector<32x32xbf16>, vector<20x32xf32> -> vector<20x32xf32>
    %c0_3 = arith.constant 0 : index
    %c0_4 = arith.constant 0 : index
    %3 = vector.load %arg5[%c0_3, %c0_4] : memref<1x32xf32, #tpu.memory_space<vmem>>, vector<1x32xf32>
    %4 = vector.broadcast %3 : vector<1x32xf32> to vector<20x32xf32>
    %5 = arith.addf %2, %4 : vector<20x32xf32>
    %c0_5 = arith.constant 0 : index
    %c0_6 = arith.constant 0 : index
    %6 = vector.load %arg6[%c0_5, %c0_6] : memref<20x32xbf16, #tpu.memory_space<vmem>>, vector<20x32xbf16>
    %7 = arith.extf %6 : vector<20x32xbf16> to vector<20x32xf32>
    %8 = arith.addf %5, %7 : vector<20x32xf32>
    %9 = arith.truncf %8 : vector<20x32xf32> to vector<20x32xbf16>
    %c0_7 = arith.constant 0 : index
    %c0_8 = arith.constant 0 : index
    %10 = vector.load %arg7[%c0_7, %c0_8] : memref<20x32xbf16, #tpu.memory_space<vmem>>, vector<20x32xbf16>
    tpu.vector_store %arg7[%c0_7, %c0_8], %9 {strides = array<i32>} : memref<20x32xbf16, #tpu.memory_space<vmem>>, vector<20x32xbf16>,
    return
  }
  func.func @transform_0(%arg0: i32, %arg1: i32, %arg2: i32) -> (i32, i32) {
    %c0_i32 = arith.constant 0 : i32
    return %arg0, %arg2 : i32, i32
  }
  func.func @transform_1(%arg0: i32, %arg1: i32, %arg2: i32) -> (i32, i32) {
    %c0_i32 = arith.constant 0 : i32
    return %arg2, %arg1 : i32, i32
  }
  func.func @transform_2(%arg0: i32, %arg1: i32, %arg2: i32) -> (i32, i32) {
    %c0_i32 = arith.constant 0 : i32
    %c0_i32_0 = arith.constant 0 : i32
    return %c0_i32, %arg1 : i32, i32
  }
  func.func @transform_3(%arg0: i32, %arg1: i32, %arg2: i32) -> (i32, i32) {
    %c0_i32 = arith.constant 0 : i32
    return %arg0, %arg1 : i32, i32
  }
  func.func @transform_4(%arg0: i32, %arg1: i32, %arg2: i32) -> (i32, i32) {
    %c0_i32 = arith.constant 0 : i32
    return %arg0, %arg1 : i32, i32
  }
}

module attributes {stable_mosaic.version = 11 : i64} {
  func.func @kernel(%arg0: i32, %arg1: i32, %arg2: i32, %arg3: memref<20x32xbf16, #tpu.memory_space<vmem>>, %arg4: memref<1x32xf32, #tpu.memory_space<vmem>>, %arg5: memref<1x32xf32, #tpu.memory_space<vmem>>, %arg6: memref<32x64xbf16, #tpu.memory_space<vmem>>, %arg7: memref<1x64xf32, #tpu.memory_space<vmem>>, %arg8: memref<20x64xbf16, #tpu.memory_space<vmem>>) attributes {dimension_semantics = [#tpu.dimension_semantics<parallel>, #tpu.dimension_semantics<parallel>, #tpu.dimension_semantics<arbitrary>], iteration_bounds = array<i64: 1, 1, 1>, scalar_prefetch = 0 : i64, scratch_operands = 0 : i64, tpu.core_type = #tpu.core_type<tc>, window_params = [{transform_indices = @transform_0, window_bounds = array<i64: 20, 32>}, {pipeline_mode = #tpu.pipeline_mode<synchronous>, transform_indices = @transform_1, window_bounds = array<i64: 1, 32>}, {pipeline_mode = #tpu.pipeline_mode<synchronous>, transform_indices = @transform_2, window_bounds = array<i64: 1, 32>}, {transform_indices = @transform_3, window_bounds = array<i64: 32, 64>}, {transform_indices = @transform_4, window_bounds = array<i64: 1, 64>}, {transform_indices = @transform_5, window_bounds = array<i64: 20, 64>}]} {
    %c0 = arith.constant 0 : index
    %c0_0 = arith.constant 0 : index
    %0 = vector.load %arg3[%c0, %c0_0] : memref<20x32xbf16, #tpu.memory_space<vmem>>, vector<20x32xbf16>
    %1 = arith.extf %0 : vector<20x32xbf16> to vector<20x32xf32>
    %cst = arith.constant dense<0.000000e+00> : vector<20xf32>
    %2 = vector.multi_reduction <add>, %1, %cst [1] : vector<20x32xf32> to vector<20xf32>
    %3 = vector.shape_cast %2 : vector<20xf32> to vector<20x1xf32>
    %cst_1 = arith.constant 3.200000e+01 : f32
    %4 = vector.broadcast %cst_1 : f32 to vector<20x1xf32>
    %5 = arith.divf %3, %4 : vector<20x1xf32>
    %6 = vector.broadcast %5 : vector<20x1xf32> to vector<20x32xf32>
    %7 = arith.subf %1, %6 : vector<20x32xf32>
    %8 = arith.mulf %7, %7 : vector<20x32xf32>
    %cst_2 = arith.constant dense<0.000000e+00> : vector<20xf32>
    %9 = vector.multi_reduction <add>, %8, %cst_2 [1] : vector<20x32xf32> to vector<20xf32>
    %10 = vector.shape_cast %9 : vector<20xf32> to vector<20x1xf32>
    %cst_3 = arith.constant 3.200000e+01 : f32
    %11 = vector.broadcast %cst_3 : f32 to vector<20x1xf32>
    %12 = arith.divf %10, %11 : vector<20x1xf32>
    %13 = vector.broadcast %5 : vector<20x1xf32> to vector<20x32xf32>
    %14 = arith.subf %1, %13 : vector<20x32xf32>
    %cst_4 = arith.constant 9.99999974E-6 : f32
    %15 = vector.broadcast %cst_4 : f32 to vector<20x1xf32>
    %16 = arith.addf %12, %15 : vector<20x1xf32>
    %17 = math.rsqrt %16 : vector<20x1xf32>
    %18 = vector.broadcast %17 : vector<20x1xf32> to vector<20x32xf32>
    %19 = arith.mulf %14, %18 : vector<20x32xf32>
    %c0_5 = arith.constant 0 : index
    %c0_6 = arith.constant 0 : index
    %20 = vector.load %arg4[%c0_5, %c0_6] : memref<1x32xf32, #tpu.memory_space<vmem>>, vector<1x32xf32>
    %21 = vector.broadcast %20 : vector<1x32xf32> to vector<20x32xf32>
    %22 = arith.mulf %19, %21 : vector<20x32xf32>
    %c0_7 = arith.constant 0 : index
    %c0_8 = arith.constant 0 : index
    %23 = vector.load %arg5[%c0_7, %c0_8] : memref<1x32xf32, #tpu.memory_space<vmem>>, vector<1x32xf32>
    %24 = vector.broadcast %23 : vector<1x32xf32> to vector<20x32xf32>
    %25 = arith.addf %22, %24 : vector<20x32xf32>
    %26 = arith.truncf %25 : vector<20x32xf32> to vector<20x32xbf16>
    %c0_9 = arith.constant 0 : index
    %c0_10 = arith.constant 0 : index
    %27 = vector.load %arg6[%c0_9, %c0_10] : memref<32x64xbf16, #tpu.memory_space<vmem>>, vector<32x64xbf16>
    %cst_11 = arith.constant dense<0.000000e+00> : vector<20x64xf32>
    %28 = tpu.matmul %26, %27, %cst_11 {dimension_numbers = #tpu.dot_dimension_numbers<[1], [0], [0], [1], [0, 0, 1, 1], [], []>} : vector<20x32xbf16>, vector<32x64xbf16>, vector<20x64xf32> -> vector<20x64xf32>
    %c0_12 = arith.constant 0 : index
    %c0_13 = arith.constant 0 : index
    %29 = vector.load %arg7[%c0_12, %c0_13] : memref<1x64xf32, #tpu.memory_space<vmem>>, vector<1x64xf32>
    %30 = vector.broadcast %29 : vector<1x64xf32> to vector<20x64xf32>
    %31 = arith.addf %28, %30 : vector<20x64xf32>
    %cst_14 = arith.constant 1.702000e+00 : f32
    %32 = vector.broadcast %cst_14 : f32 to vector<20x64xf32>
    %33 = arith.mulf %32, %31 : vector<20x64xf32>
    %34 = arith.negf %33 : vector<20x64xf32>
    %35 = math.exp %34 : vector<20x64xf32>
    %cst_15 = arith.constant 1.000000e+00 : f32
    %36 = vector.broadcast %cst_15 : f32 to vector<20x64xf32>
    %37 = arith.addf %36, %35 : vector<20x64xf32>
    %38 = arith.divf %36, %37 : vector<20x64xf32>
    %39 = arith.mulf %31, %38 : vector<20x64xf32>
    %40 = arith.truncf %39 : vector<20x64xf32> to vector<20x64xbf16>
    %c0_16 = arith.constant 0 : index
    %c0_17 = arith.constant 0 : index
    %41 = vector.load %arg8[%c0_16, %c0_17] : memref<20x64xbf16, #tpu.memory_space<vmem>>, vector<20x64xbf16>
    tpu.vector_store %arg8[%c0_16, %c0_17], %40 {strides = array<i32>} : memref<20x64xbf16, #tpu.memory_space<vmem>>, vector<20x64xbf16>,
    return
  }
  func.func @transform_0(%arg0: i32, %arg1: i32, %arg2: i32) -> (i32, i32) {
    %c0_i32 = arith.constant 0 : i32
    return %arg0, %arg2 : i32, i32
  }
  func.func @transform_1(%arg0: i32, %arg1: i32, %arg2: i32) -> (i32, i32) {
    %c0_i32 = arith.constant 0 : i32
    %c0_i32_0 = arith.constant 0 : i32
    %c0_i32_1 = arith.constant 0 : i32
    return %c0_i32, %c0_i32_0 : i32, i32
  }
  func.func @transform_2(%arg0: i32, %arg1: i32, %arg2: i32) -> (i32, i32) {
    %c0_i32 = arith.constant 0 : i32
    %c0_i32_0 = arith.constant 0 : i32
    %c0_i32_1 = arith.constant 0 : i32
    return %c0_i32, %c0_i32_0 : i32, i32
  }
  func.func @transform_3(%arg0: i32, %arg1: i32, %arg2: i32) -> (i32, i32) {
    %c0_i32 = arith.constant 0 : i32
    return %arg2, %arg1 : i32, i32
  }
  func.func @transform_4(%arg0: i32, %arg1: i32, %arg2: i32) -> (i32, i32) {
    %c0_i32 = arith.constant 0 : i32
    %c0_i32_0 = arith.constant 0 : i32
    return %c0_i32, %arg1 : i32, i32
  }
  func.func @transform_5(%arg0: i32, %arg1: i32, %arg2: i32) -> (i32, i32) {
    %c0_i32 = arith.constant 0 : i32
    return %arg0, %arg1 : i32, i32
  }
}

module attributes {stable_mosaic.version = 11 : i64} {
  func.func @kernel(%arg0: i32, %arg1: i32, %arg2: i32, %arg3: memref<20x64xbf16, #tpu.memory_space<vmem>>, %arg4: memref<64x32xbf16, #tpu.memory_space<vmem>>, %arg5: memref<1x32xf32, #tpu.memory_space<vmem>>, %arg6: memref<20x32xbf16, #tpu.memory_space<vmem>>, %arg7: memref<20x32xbf16, #tpu.memory_space<vmem>>) attributes {dimension_semantics = [#tpu.dimension_semantics<parallel>, #tpu.dimension_semantics<parallel>, #tpu.dimension_semantics<arbitrary>], iteration_bounds = array<i64: 1, 1, 1>, scalar_prefetch = 0 : i64, scratch_operands = 0 : i64, tpu.core_type = #tpu.core_type<tc>, window_params = [{transform_indices = @transform_0, window_bounds = array<i64: 20, 64>}, {transform_indices = @transform_1, window_bounds = array<i64: 64, 32>}, {transform_indices = @transform_2, window_bounds = array<i64: 1, 32>}, {transform_indices = @transform_3, window_bounds = array<i64: 20, 32>}, {transform_indices = @transform_4, window_bounds = array<i64: 20, 32>}]} {
    %c0 = arith.constant 0 : index
    %c0_0 = arith.constant 0 : index
    %0 = vector.load %arg3[%c0, %c0_0] : memref<20x64xbf16, #tpu.memory_space<vmem>>, vector<20x64xbf16>
    %c0_1 = arith.constant 0 : index
    %c0_2 = arith.constant 0 : index
    %1 = vector.load %arg4[%c0_1, %c0_2] : memref<64x32xbf16, #tpu.memory_space<vmem>>, vector<64x32xbf16>
    %cst = arith.constant dense<0.000000e+00> : vector<20x32xf32>
    %2 = tpu.matmul %0, %1, %cst {dimension_numbers = #tpu.dot_dimension_numbers<[1], [0], [0], [1], [0, 0, 1, 1], [], []>} : vector<20x64xbf16>, vector<64x32xbf16>, vector<20x32xf32> -> vector<20x32xf32>
    %c0_3 = arith.constant 0 : index
    %c0_4 = arith.constant 0 : index
    %3 = vector.load %arg5[%c0_3, %c0_4] : memref<1x32xf32, #tpu.memory_space<vmem>>, vector<1x32xf32>
    %4 = vector.broadcast %3 : vector<1x32xf32> to vector<20x32xf32>
    %5 = arith.addf %2, %4 : vector<20x32xf32>
    %c0_5 = arith.constant 0 : index
    %c0_6 = arith.constant 0 : index
    %6 = vector.load %arg6[%c0_5, %c0_6] : memref<20x32xbf16, #tpu.memory_space<vmem>>, vector<20x32xbf16>
    %7 = arith.extf %6 : vector<20x32xbf16> to vector<20x32xf32>
    %8 = arith.addf %5, %7 : vector<20x32xf32>
    %9 = arith.truncf %8 : vector<20x32xf32> to vector<20x32xbf16>
    %c0_7 = arith.constant 0 : index
    %c0_8 = arith.constant 0 : index
    %10 = vector.load %arg7[%c0_7, %c0_8] : memref<20x32xbf16, #tpu.memory_space<vmem>>, vector<20x32xbf16>
    tpu.vector_store %arg7[%c0_7, %c0_8], %9 {strides = array<i32>} : memref<20x32xbf16, #tpu.memory_space<vmem>>, vector<20x32xbf16>,
    return
  }
  func.func @transform_0(%arg0: i32, %arg1: i32, %arg2: i32) -> (i32, i32) {
    %c0_i32 = arith.constant 0 : i32
    return %arg0, %arg2 : i32, i32
  }
  func.func @transform_1(%arg0: i32, %arg1: i32, %arg2: i32) -> (i32, i32) {
    %c0_i32 = arith.constant 0 : i32
    return %arg2, %arg1 : i32, i32
  }
  func.func @transform_2(%arg0: i32, %arg1: i32, %arg2: i32) -> (i32, i32) {
    %c0_i32 = arith.constant 0 : i32
    %c0_i32_0 = arith.constant 0 : i32
    return %c0_i32, %arg1 : i32, i32
  }
  func.func @transform_3(%arg0: i32, %arg1: i32, %arg2: i32) -> (i32, i32) {
    %c0_i32 = arith.constant 0 : i32
    return %arg0, %arg1 : i32, i32
  }
  func.func @transform_4(%arg0: i32, %arg1: i32, %arg2: i32) -> (i32, i32) {
    %c0_i32 = arith.constant 0 : i32
    return %arg0, %arg1 : i32, i32
  }
}

</mosaic_0001>

<bundles_post_ra>
// kernel: averager_forward.13
= control target key start
LH: loop header
LB: loop body
LE: loop exit
PB: predicated region body
PF: predicated region fallthrough
CT: control target
= control target key end

     0   :  { %vm20_vm0 = vcmask 261120   ;;  %vm27_vm1 = vcmask 257024   ;;  %vm97_vm2 = vcmask 254976   ;;  %s170_s0 = inlined_call_operand.vmem [shape: bf16[20,32], index: 0, kind: input, shape index: {}]   ;;  %s171_s1 = inlined_call_operand.vmem [shape: f32[1,32], index: 1, kind: input, shape index: {}]   ;;  %s172_s2 = inlined_call_operand.vmem [shape: f32[1,32], index: 2, kind: input, shape index: {}]   ;;  %s173_s3 = inlined_call_operand.vmem [shape: bf16[20,32], index: 3, kind: output, shape index: {}]  }
   0x1   :  { %v112_v0 = vld [vmem:[%s170_s0] sm:$0xff]   ;;  %v16_v1 = vld [vmem:[%s170_s0 + $0x8] sm:$0x3] }
   0x2   :  { %v113_v2 = vunpack.c.l.bf16 %v112_v0  ;;  %v19_v3 = vunpack.c.l.bf16 %v16_v1  ;;  %v114_v4 = vunpack.c.h.bf16 %v112_v0  ;;  %v103_v33 = vld [vmem:[%s171_s1] ss:$0 sm:$0xff] }
   0x3   :  { %v104_v35 = vld [vmem:[%s172_s2] ss:$0 sm:$0xff] }
   0x4   :  { %v21_v5 = vsel %vm20_vm0, %v113_v2, 0.0  ;;  %v28_v6 = vsel %vm27_vm1, %v19_v3, 0.0  ;;  %v24_v7 = vsel %vm20_vm0, %v114_v4, 0.0 }
   0x5   :  { %22 = vadd.xlane.f32.xlu0 %v21_v5  ;;  %29 = vadd.xlane.f32.xlu1 %v28_v6 }
   0x9   :  { %25 = vadd.xlane.f32.xlu0 %v24_v7 }
  0x92   :  { %v23_v8 = vpop.xlane.xlu0 %22  ;;  %v30_v9 = vpop.xlane.xlu1 %29 }
  0x93   :  { %v32_v10 = vmul.f32 0.03125, %v23_v8  ;;  %v34_v11 = vmul.f32 0.03125, %v30_v9 }
  0x95   :  { %v35_v12 = vsub.f32 %v113_v2, %v32_v10  ;;  %v37_v13 = vsub.f32 %v19_v3, %v34_v11 }
  0x96   :  { %v26_v14 = vpop.xlane.xlu0 %25 }
  0x97   :  { %v33_v15 = vmul.f32 0.03125, %v26_v14  ;;  %v38_v16 = vmul.f32 %v35_v12, %v35_v12  ;;  %v40_v17 = vmul.f32 %v37_v13, %v37_v13 }
  0x99   :  { %v36_v18 = vsub.f32 %v114_v4, %v33_v15  ;;  %v41_v19 = vsel %vm20_vm0, %v38_v16, 0.0  ;;  %v47_v20 = vsel %vm27_vm1, %v40_v17, 0.0 }
  0x9a   :  { %42 = vadd.xlane.f32.xlu1 %v41_v19 }
  0x9b   :  { %v39_v21 = vmul.f32 %v36_v18, %v36_v18 }
  0x9d   :  { %v44_v22 = vsel %vm20_vm0, %v39_v21, 0.0 }
  0x9e   :  { %48 = vadd.xlane.f32.xlu1 %v47_v20  ;;  %45 = vadd.xlane.f32.xlu0 %v44_v22 }
 0x127   :  { %v43_v23 = vpop.xlane.xlu1 %42 }
 0x128   :  { %v50_v24 = vmul.f32 0.03125, %v43_v23 }
 0x12a   :  { %v53_v25 = vadd.f32 1e-05, %v50_v24 }
 0x12b   :  { %v49_v26 = vpop.xlane.xlu1 %48  ;;  %v46_v27 = vpop.xlane.xlu0 %45 }
 0x12c   :  { %115 = vrsqrt.f32 %v53_v25  ;;  %v52_v28 = vmul.f32 0.03125, %v49_v26  ;;  %v51_v29 = vmul.f32 0.03125, %v46_v27 }
 0x12e   :  { %v55_v30 = vadd.f32 1e-05, %v52_v28  ;;  %v54_v31 = vadd.f32 1e-05, %v51_v29 }
 0x130   :  { %117 = vrsqrt.f32 %v55_v30 }
 0x131   :  { %119 = vrsqrt.f32 %v54_v31 }
 0x136   :  { %v116_v32 = vpop.eup %115 }
 0x137   :  { %v59_v34 = vmul.f32 %v116_v32, %v35_v12 }
 0x139   :  { %v69_v36 = vmul.f32 %v103_v33, %v59_v34 }
 0x13a   :  { %v118_v37 = vpop.eup %117 }
 0x13b   :  { %v120_v38 = vpop.eup %119  ;;  %v79_v39 = vadd.f32 %v104_v35, %v69_v36  ;;  %v61_v40 = vmul.f32 %v118_v37, %v37_v13 }
 0x13c   :  { %v60_v41 = vmul.f32 %v120_v38, %v36_v18 }
 0x13d   :  { %v108_v42 = vpack.c.bf16 %v79_v39, %v79_v39  ;;  %v71_v43 = vmul.f32 %v103_v33, %v61_v40 }
 0x13e   :  { %v70_v44 = vmul.f32 %v103_v33, %v60_v41 }
 0x13f   :  { %95 = vst.msk [vmem:[%s173_s3] sm:$0xf] %vm27_vm1, %v108_v42  ;;  %v81_v45 = vadd.f32 %v104_v35, %v71_v43 }
 0x140   :  { %v80_v46 = vadd.f32 %v104_v35, %v70_v44 }
 0x141   :  { %v110_v47 = vpack.c.bf16 %v81_v45, %v81_v45 }
 0x142   :  { %v109_v48 = vpack.c.bf16 %v80_v46, %v80_v46 }
 0x143   :  { %98 = vst.msk [vmem:[%s173_s3 + $0x8] sm:$0x3] %vm97_vm2, %v110_v47 }
 0x144   :  { %96 = vst.msk [vmem:[%s173_s3 + $0x4] sm:$0xf] %vm27_vm1, %v109_v48 }

// kernel: averager_forward.14
= control target key start
LH: loop header
LB: loop body
LE: loop exit
PB: predicated region body
PF: predicated region fallthrough
CT: control target
= control target key end

     0   :  { %vm27_vm0 = vcmask 261120   ;;  %vm34_vm1 = vcmask 257024   ;;  %vm184_vm2 = vcmask 779264   ;;  %vm181_vm3 = vcmask 781312   ;;  %s295_s0 = inlined_call_operand.vmem [shape: bf16[20,32], index: 0, kind: input, shape index: {}]   ;;  %s296_s3 = inlined_call_operand.vmem [shape: bf16[32,96], index: 3, kind: input, shape index: {}]   ;;  %s297_s1 = inlined_call_operand.vmem [shape: f32[1,32], index: 1, kind: input, shape index: {}]   ;;  %s298_s2 = inlined_call_operand.vmem [shape: f32[1,32], index: 2, kind: input, shape index: {}]   ;;  %s299_s4 = inlined_call_operand.vmem [shape: f32[1,96], index: 4, kind: input, shape index: {}]   ;;  %s300_s5 = inlined_call_operand.vmem [shape: bf16[20,96], index: 5, kind: output, shape index: {}]  }
   0x1   :  { %v204_v0 = vld [vmem:[%s295_s0] sm:$0xff]   ;;  %v23_v1 = vld [vmem:[%s295_s0 + $0x8] sm:$0x3] }
   0x2   :  { %v205_v2 = vunpack.c.l.bf16 %v204_v0  ;;  %v26_v3 = vunpack.c.l.bf16 %v23_v1  ;;  %v206_v4 = vunpack.c.h.bf16 %v204_v0  ;;  %v219_v23 = vld [vmem:[%s296_s3] sm:$0xff]   ;;  %v220_v24 = vld [vmem:[%s296_s3 + $0x8] sm:$0xff]  }
   0x3   :  { %211 = vmatprep.subr.bf16.mxu0 %v219_v23  ;;  %v190_v36 = vld [vmem:[%s297_s1] ss:$0 sm:$0xff] }
   0x4   :  { %v28_v5 = vsel %vm27_vm0, %v205_v2, 0.0  ;;  %v35_v6 = vsel %vm34_vm1, %v26_v3, 0.0  ;;  %v31_v7 = vsel %vm27_vm0, %v206_v4, 0.0  ;;  %212 = vmatpush3.bf16.msra.mxu0 %v219_v23  ;;  %v191_v42 = vld [vmem:[%s298_s2] ss:$0 sm:$0xff] }
   0x5   :  { %29 = vadd.xlane.f32.xlu0 %v28_v5  ;;  %36 = vadd.xlane.f32.xlu1 %v35_v6  ;;  %v192_v50 = vld [vmem:[%s299_s4] ss:$0 sm:$0xff] }
   0x6   :  { %213 = vmatprep.subr.bf16.mxu0 %v220_v24 }
   0x8   :  { %214 = vmatpush3.bf16.msra.mxu0 %v220_v24 }
   0x9   :  { %32 = vadd.xlane.f32.xlu0 %v31_v7 }
  0x92   :  { %v30_v8 = vpop.xlane.xlu0 %29  ;;  %v37_v9 = vpop.xlane.xlu1 %36 }
  0x93   :  { %v39_v10 = vmul.f32 0.03125, %v30_v8  ;;  %v41_v11 = vmul.f32 0.03125, %v37_v9 }
  0x95   :  { %v42_v12 = vsub.f32 %v205_v2, %v39_v10  ;;  %v44_v13 = vsub.f32 %v26_v3, %v41_v11 }
  0x96   :  { %v33_v14 = vpop.xlane.xlu0 %32 }
  0x97   :  { %v40_v15 = vmul.f32 0.03125, %v33_v14  ;;  %v45_v16 = vmul.f32 %v42_v12, %v42_v12  ;;  %v47_v17 = vmul.f32 %v44_v13, %v44_v13 }
  0x99   :  { %v43_v18 = vsub.f32 %v206_v4, %v40_v15  ;;  %v48_v19 = vsel %vm27_vm0, %v45_v16, 0.0  ;;  %v54_v20 = vsel %vm34_vm1, %v47_v17, 0.0 }
  0x9a   :  { %49 = vadd.xlane.f32.xlu1 %v48_v19 }
  0x9b   :  { %v46_v21 = vmul.f32 %v43_v18, %v43_v18 }
  0x9d   :  { %v51_v22 = vsel %vm27_vm0, %v46_v21, 0.0 }
  0x9e   :  { %55 = vadd.xlane.f32.xlu1 %v54_v20  ;;  %52 = vadd.xlane.f32.xlu0 %v51_v22 }
 0x127   :  { %v50_v25 = vpop.xlane.xlu1 %49 }
 0x128   :  { %v57_v26 = vmul.f32 0.03125, %v50_v25 }
 0x12a   :  { %v60_v27 = vadd.f32 1e-05, %v57_v26 }
 0x12b   :  { %v56_v28 = vpop.xlane.xlu1 %55  ;;  %v53_v29 = vpop.xlane.xlu0 %52 }
 0x12c   :  { %221 = vrsqrt.f32 %v60_v27  ;;  %v59_v30 = vmul.f32 0.03125, %v56_v28  ;;  %v58_v31 = vmul.f32 0.03125, %v53_v29 }
 0x12e   :  { %v62_v32 = vadd.f32 1e-05, %v59_v30  ;;  %v61_v33 = vadd.f32 1e-05, %v58_v31 }
 0x130   :  { %223 = vrsqrt.f32 %v62_v32 }
 0x131   :  { %225 = vrsqrt.f32 %v61_v33 }
 0x136   :  { %v222_v34 = vpop.eup %221 }
 0x137   :  { %v66_v35 = vmul.f32 %v222_v34, %v42_v12 }
 0x139   :  { %v76_v41 = vmul.f32 %v190_v36, %v66_v35 }
 0x13a   :  { %v224_v37 = vpop.eup %223 }
 0x13b   :  { %v226_v38 = vpop.eup %225  ;;  %v68_v39 = vmul.f32 %v224_v37, %v44_v13  ;;  %v86_v46 = vadd.f32 %v191_v42, %v76_v41 }
 0x13c   :  { %v67_v40 = vmul.f32 %v226_v38, %v43_v18 }
 0x13d   :  { %v78_v43 = vmul.f32 %v190_v36, %v68_v39 }
 0x13e   :  { %v77_v44 = vmul.f32 %v190_v36, %v67_v40 }
 0x13f   :  { %v88_v45 = vadd.f32 %v191_v42, %v78_v43 }
 0x140   :  { %v87_v47 = vadd.f32 %v191_v42, %v77_v44 }
 0x141   :  { %v90_v48 = vpack.c.bf16 %v88_v45, %v88_v45 }
 0x142   :  { %v89_v49 = vpack.c.bf16 %v87_v47, %v86_v46 }
 0x144   :  { %215 = vmatprep.mubr.msk.bf16.mxu0 %vm27_vm0, %v89_v49 }
 0x145   :  { %216 = vmatmul.mubr.msk.bf16.vlgmr.msra.gmra.mrb[0].mxu0 %vm27_vm0, %v90_v48 }
 0x218   :  { %v217_v51 = vpop.f32.mrb[0].mxu0 }
 0x219   :  { %v163_v52 = vadd.f32 %v217_v51, %v192_v50  ;;  %v154_v53 = vpop.f32.mrb[1].mxu0 }
 0x21a   :  { %v155_v54 = vadd.f32 %v192_v50, %v154_v53  ;;  %v218_v55 = vpop.f32.mrb[2].mxu0 }
 0x21b   :  { %v202_v56 = vpack.c.bf16 %v163_v52, %v163_v52  ;;  %v157_v57 = vpop.f32.mrb[3].mxu0 }
 0x21c   :  { %v200_v58 = vpack.c.bf16 %v155_v54, %v155_v54  ;;  %v158_v59 = vadd.f32 %v192_v50, %v157_v57 }
 0x21d   :  { %185 = vst.msk [vmem:[%s300_s5 + $0x8] sm:$0x3] %vm184_vm2, %v202_v56 }
 0x21e   :  { %182 = vst.msk [vmem:[%s300_s5] sm:$0xf] %vm181_vm3, %v200_v58  ;;  %v201_v60 = vpack.c.bf16 %v158_v59, %v158_v59 }
 0x220   :  { %183 = vst.msk [vmem:[%s300_s5 + $0x4] sm:$0xf] %vm181_vm3, %v201_v60 }

// kernel: averager_forward.12
= control target key start
LH: loop header
LB: loop body
LE: loop exit
PB: predicated region body
PF: predicated region fallthrough
CT: control target
= control target key end

     0   :  { %v225_v0 = vmov 0   ;;  %vm129_vm0 = vcmask 523264   ;;  %vm182_vm1 = vcmask 257024   ;;  %s297_s1 = inlined_call_operand.vmem [shape: bf16[192,32], index: 1, kind: input, shape index: {}]   ;;  %s298_s0 = inlined_call_operand.vmem [shape: bf16[16,192], index: 0, kind: input, shape index: {}]   ;;  %s299_s2 = inlined_call_operand.vmem [shape: f32[1,32], index: 2, kind: input, shape index: {}]   ;;  %s300_s3 = inlined_call_operand.vmem [shape: bf16[16,32], index: 3, kind: output, shape index: {}]  }
   0x1   :  { %133 = vmatprep.subr.bf16.mxu0 %v225_v0  ;;  %v210_v1 = vld [vmem:[%s297_s1] sm:$0xff]   ;;  %v211_v2 = vld [vmem:[%s297_s1 + $0x8] sm:$0xff]   ;;  %v212_v3 = vld [vmem:[%s297_s1 + $0x10] sm:$0xff]  }
   0x2   :  { %134 = vmatpush1.bf16.msra.mxu0 %v210_v1  ;;  %v213_v4 = vld [vmem:[%s297_s1 + $0x18] sm:$0xff]   ;;  %v224_v5 = vld [vmem:[%s298_s0 + $0x4] ss:$8 sps:$4 sm:$0xff]   ;;  %v216_v8 = vld [vmem:[%s297_s1 + $0x30] sm:$0xff]  }
   0x3   :  { %135 = vmatprep.subr.bf16.mxu0 %v225_v0  ;;  %v214_v6 = vld [vmem:[%s297_s1 + $0x20] sm:$0xff]   ;;  %204 = vmatprep.mubr.msk.bf16.mxu0 %vm129_vm0, %v224_v5  ;;  %v215_v7 = vld [vmem:[%s297_s1 + $0x28] sm:$0xff]   ;;  %v217_v9 = vld [vmem:[%s297_s1 + $0x38] sm:$0xff]  }
   0x4   :  { %v218_v10 = vld [vmem:[%s297_s1 + $0x40] sm:$0xff]   ;;  %v219_v11 = vld [vmem:[%s297_s1 + $0x48] sm:$0xff]   ;;  %v220_v12 = vld [vmem:[%s297_s1 + $0x50] sm:$0xff]  }
   0x5   :  { %v221_v13 = vld [vmem:[%s297_s1 + $0x58] sm:$0xff]   ;;  %v222_v14 = vld [vmem:[%s298_s0] ss:$8 sps:$4 sm:$0xff]  }
   0x6   :  { %136 = vmatpush1.bf16.msra.mxu0 %v211_v2  ;;  %v189_v15 = vld [vmem:[%s299_s2] ss:$0 sm:$0xff] }
   0x7   :  { %137 = vmatprep.subr.bf16.mxu0 %v225_v0 }
   0xa   :  { %138 = vmatpush1.bf16.msra.mxu0 %v212_v3 }
   0xb   :  { %139 = vmatprep.subr.bf16.mxu0 %v225_v0 }
   0xe   :  { %140 = vmatpush1.bf16.msra.mxu0 %v213_v4 }
   0xf   :  { %141 = vmatprep.subr.bf16.mxu0 %v225_v0 }
  0x12   :  { %142 = vmatpush1.bf16.msra.mxu0 %v214_v6 }
  0x13   :  { %143 = vmatprep.subr.bf16.mxu0 %v225_v0 }
  0x16   :  { %144 = vmatpush1.bf16.msra.mxu0 %v215_v7 }
  0x17   :  { %145 = vmatprep.subr.bf16.mxu0 %v225_v0 }
  0x1a   :  { %146 = vmatpush1.bf16.msra.mxu0 %v216_v8 }
  0x1b   :  { %147 = vmatprep.subr.bf16.mxu0 %v225_v0 }
  0x1e   :  { %148 = vmatpush1.bf16.msra.mxu0 %v217_v9 }
  0x1f   :  { %149 = vmatprep.subr.bf16.mxu0 %v225_v0 }
  0x22   :  { %150 = vmatpush1.bf16.msra.mxu0 %v218_v10 }
  0x23   :  { %151 = vmatprep.subr.bf16.mxu0 %v225_v0 }
  0x26   :  { %152 = vmatpush1.bf16.msra.mxu0 %v219_v11 }
  0x27   :  { %153 = vmatprep.subr.bf16.mxu0 %v225_v0 }
  0x2a   :  { %154 = vmatpush1.bf16.msra.mxu0 %v220_v12 }
  0x2b   :  { %155 = vmatprep.subr.bf16.mxu0 %v225_v0 }
  0x2e   :  { %156 = vmatpush1.bf16.msra.mxu0 %v221_v13 }
  0x31   :  { %166 = vmatmul.mubr.bf16.vlgmr.msra.gmra.mrb[0].mxu0 %v222_v14 }
 0x104   :  { %v167_v16 = vpop.f32.mrb[0].mxu0 }
 0x105   :  { %v168_v17 = vadd.f32 %v189_v15, %v167_v16  ;;  %v169_v18 = vpop.f32.mrb[1].mxu0 }
 0x106   :  { %v170_v19 = vpop.f32.mrb[2].mxu0 }
 0x107   :  { %v207_v20 = vpack.c.bf16 %v168_v17, %v168_v17  ;;  %v171_v21 = vadd.f32 %v189_v15, %v170_v19  ;;  %v172_v22 = vpop.f32.mrb[3].mxu0 }
 0x109   :  { %183 = vst.msk [vmem:[%s300_s3] sm:$0xf] %vm182_vm1, %v207_v20  ;;  %v208_v23 = vpack.c.bf16 %v171_v21, %v171_v21 }
 0x10b   :  { %184 = vst.msk [vmem:[%s300_s3 + $0x4] sm:$0xf] %vm182_vm1, %v208_v23 }

// kernel: averager_forward.15
= control target key start
LH: loop header
LB: loop body
LE: loop exit
PB: predicated region body
PF: predicated region fallthrough
CT: control target
= control target key end

     0   :  { %s988_s12 = smov 0   ;;  %s990_s13 = smov 0   ;;  %s1101_s0 = inlined_call_operand.vmem [shape: bf16[4,5,32], index: 0, kind: input, shape index: {}]   ;;  %s1102_s1 = inlined_call_operand.vmem [shape: bf16[4,5,32], index: 1, kind: input, shape index: {}]   ;;  %s1103_s2 = inlined_call_operand.vmem [shape: bf16[4,5,32], index: 2, kind: input, shape index: {}]   ;;  %s1104_s3 = inlined_call_operand.vmem [shape: bf16[4,5,32], index: 3, kind: output, shape index: {}]  }
   0x1   :  { %s992_s14 = smov 0  }
   0x2 LB: > { %s25_s15 = sadd.s32 1, %s953_s13  ;;  %p801_p0 = scmp.ge.s32.totalorder %s957_s14, 1  ;;  %s957_s14 = sphi %s992_s14, %s13_s14   ;;  %s953_s13 = sphi %s990_s13, %s1106_s13   ;;  %s949_s12 = sphi %s988_s12, %s1105_s12  }
   0x3   : > { %p27_p1 = scmp.ge.s32.totalorder %s25_s15, 4  ;;  %p168_p2 = scmp.lt.s32.totalorder %s957_s14, 5 }
   0x5   : > { %s1108_s15 = smov (%p27_p1, %s25_s15), 0  ;;  %p169_p3 = pnand %p801_p0, %p168_p2 }
   0x6   : > { %p201_p4 = scmp.lt.s32.totalorder (!%p169_p3), %s949_s12, 3  ;;  %v959_v0 = vmov (!%p169_p3), 0.0   ;;  %vm960_vm0 = vmmov (!%p169_p3), 0   ;;  %vm224_vm1 = vcmask (!%p169_p3), 64512   ;;  %vm272_vm2 = vcmask (!%p169_p3), 36864   ;;  %s961_s23 = smov (!%p169_p3), 120  }
   0x7   : > { %172 = sbr.rel (%p169_p3) target bundleno = 1479 (0x5c7), region = 32  ;;  %835 = vmatprep.subr.bf16.mxu0 (!%p169_p3), %v959_v0  ;;  %837 = vmatprep.mubr.msk.bf16.mxu0 (!%p169_p3), %vm960_vm0, %v959_v0  ;;  %s962_s24 = smov (!%p169_p3), 112   ;;  %vm289_vm3 = vcmask (!%p169_p3), 1041408   ;;  %vm290_vm4 = vcmask (!%p169_p3), 1042432   ;;  %v964_v18 = vmov (!%p169_p3), 65535   ;;  %vm285_vm5 = vcmask (!%p169_p3), 39936  }
   0x8   : > { %841 = vmatprep.subr.bf16.mxu1 (!%p169_p3), %v959_v0  ;;  %843 = vmatprep.mubr.msk.bf16.mxu1 (!%p169_p3), %vm960_vm0, %v959_v0  ;;  %s963_s25 = smov (!%p169_p3), 104   ;;  %v291_v19 = vsel (!%p169_p3), %vm289_vm3, 4294967295, %v964_v18  ;;  %s965_s29 = smov (!%p169_p3), 8   ;;  %vm691_vm6 = vcmask (!%p169_p3), 130048   ;;  %vm693_vm7 = vcmask (!%p169_p3), 195584   ;;  %vm696_vm8 = vcmask (!%p169_p3), 256000  }
   0x9   : > { %v1040_v20 = vsel (!%p169_p3), %vm290_vm4, %v291_v19, 0  ;;  %s966_s30 = smov (!%p169_p3), 16   ;;  %s967_s4 = smov (!%p169_p3), 24   ;;  %vm697_vm9 = vsmask.f32 (!%p169_p3), 2304 }
   0xa   : > { %vm698_vm10 = vmand (!%p169_p3), %vm696_vm8, %vm697_vm9 }
   0xe   : > { %s1110_s12 = smov (!%p201_p4, %s949_s12), 3 }
   0xf   : > { %s1012_s16 = sshll.u32 %s1110_s12, 2 }
  0x10   : > { %s208_s19 = scalar_lea.vmem %s1102_s1, %s1012_s16  ;;  %s204_s22 = scalar_lea.vmem %s1101_s0, %s1012_s16 }
  0x11   : > { %v222_v1 = vld [vmem:[%s208_s19] sm:$0x7]  ;;  %s212_s28 = scalar_lea.vmem %s1103_s2, %s1012_s16  ;;  %s219_s7 = scalar_lea.vmem %s1104_s3, %s1012_s16 }
  0x12   : > { %v229_v2 = vsel %vm224_vm1, %v222_v1, 0  ;;  %v221_v3 = vld [vmem:[%s204_s22] sm:$0x7]  ;;  %v809_v10 = vcombine.low %v222_v1, %v222_v1 }
  0x13   : > { %836 = vmatpush3.bf16.xpose.msra.mxu0 %v229_v2  ;;  %v808_v11 = vcombine.low %v221_v3, %v221_v3  ;;  %v1038_v17 = vld [vmem:[%s212_s28] sm:$0x7] }
  0x14   : > { %853 = vmatprep.subr.bf16.mxu0 %v959_v0  ;;  %344 = vrot.lane.b32.xlu1 %v809_v10, %s961_s23  ;;  %v294_v21 = vand.u32 %v1040_v20, %v1038_v17 }
  0x16   : > { %842 = vmatpush3.bf16.msra.mxu1 %v294_v21 }
  0x17   : > { %847 = vmatprep.subr.bf16.mxu1 %v959_v0 }
  0x18   : > { %339 = vrot.lane.b32.xlu1 %v808_v11, %s961_s23 }
  0x1a   : > { %838 = vmatmul.mubr.msk.bf16.vlgmr.msra.gmra.mrb[0].mxu0 %vm224_vm1, %v221_v3 }
  0x1b   : > { %855 = vmatprep.mubr.msk.bf16.mxu0 %vm960_vm0, %v959_v0 }
  0x1c   : > { %456 = vrot.lane.b32.xlu1 %v808_v11, %s962_s24 }
  0x20   : > { %569 = vrot.lane.b32.xlu1 %v809_v10, %s963_s25 }
  0x24   : > { %567 = vrot.lane.b32.xlu1 %v808_v11, %s963_s25 }
  0x86   : > { %v345_v24 = vpop.permute.xlu1 %344 }
  0x87   : > { %v350_v26 = vsel %vm224_vm1, %v345_v24, 0 }
  0x8a   : > { %v340_v28 = vpop.permute.xlu1 %339 }
  0x8e   : > { %v457_v30 = vpop.permute.xlu1 %456 }
  0x92   : > { %v570_v32 = vpop.permute.xlu1 %569 }
  0x93   : > { %v575_v33 = vsel %vm224_vm1, %v570_v32, 0 }
  0x96   : > { %v568_v34 = vpop.permute.xlu1 %567 }
  0xed   : > { %v265_v4 = vpop.f32.mrb[0].mxu0 }
  0xee   : > { %v271_v5 = vmul.f32 0.35355338, %v265_v4  ;;  %v839_v6 = vpop.f32.mrb[1].mxu0  ;;  %v811_v4 = vcombine.low %v1038_v17, %v1038_v17 }
  0xef   : > { %v268_v7 = vpop.f32.mrb[2].mxu0 }
  0xf0   : > { %v840_v8 = vpop.f32.mrb[3].mxu0  ;;  %v273_v9 = vsel %vm272_vm2, %v271_v5, -inf }
  0xf1   : > { %274 = vmax.xlane.f32.xlu0 %v273_v9 }
 0x17e   : > { %v275_v12 = vpop.xlane.xlu0 %274 }
 0x17f   : > { %v276_v13 = vsub.f32 %v271_v5, %v275_v12 }
 0x181   : > { %v277_v14 = vmul.f32 1.442695, %v276_v13 }
 0x183   : > { %919 = vpow2.f32 %v277_v14 }
 0x18d   : > { %v920_v15 = vpop.eup %919 }
 0x18e   : > { %v279_v16 = vsel %vm272_vm2, %v920_v15, 0.0 }
 0x18f   : > { %280 = vadd.xlane.f32.xlu0 %v279_v16 }
 0x1a5   : > { %458 = vrot.lane.b32.xlu0 %v809_v10, %s962_s24 }
 0x21c   : > { %v281_v22 = vpop.xlane.xlu0 %280 }
 0x21d   : > { %921 = vrcp.f32 %v281_v22 }
 0x220   : > { %v459_v29 = vpop.permute.xlu0 %458 }
 0x221   : > { %v464_v31 = vsel %vm224_vm1, %v459_v29, 0 }
 0x227   : > { %v922_v23 = vpop.eup %921 }
 0x228   : > { %v283_v25 = vmul.f32 %v922_v23, %v920_v15 }
 0x22a   : > { %v284_v27 = vpack.c.bf16 %v283_v25, %v283_v25 }
 0x22c   : > { %844 = vmatmul.mubr.msk.bf16.vlgmr.msra.gmra.mrb[0].mxu1 %vm285_vm5, %v284_v27 }
 0x22d   : > { %848 = vmatpush3.bf16.xpose.msra.mxu1 %v350_v26  ;;  %849 = vmatprep.mubr.msk.bf16.mxu1 %vm960_vm0, %v959_v0 }
 0x22e   : > { %859 = vmatprep.subr.bf16.mxu1 %v959_v0 }
 0x234   : > { %850 = vmatmul.mubr.msk.bf16.vlgmr.msra.gmra.mrb[4].mxu1 %vm224_vm1, %v340_v28 }
 0x235   : > { %860 = vmatpush3.bf16.xpose.msra.mxu1 %v464_v31  ;;  %861 = vmatprep.mubr.msk.bf16.mxu1 %vm960_vm0, %v959_v0 }
 0x236   : > { %871 = vmatprep.subr.bf16.mxu1 %v959_v0 }
 0x23c   : > { %862 = vmatmul.mubr.msk.bf16.vlgmr.msra.gmra.mrb[8].mxu1 %vm224_vm1, %v457_v30 }
 0x23d   : > { %872 = vmatpush3.bf16.xpose.msra.mxu1 %v575_v33  ;;  %873 = vmatprep.mubr.msk.bf16.mxu1 %vm960_vm0, %v959_v0 }
 0x244   : > { %874 = vmatmul.mubr.msk.bf16.vlgmr.msra.gmra.mrb[12].mxu1 %vm224_vm1, %v568_v34 }
 0x2ff   : > { %v1061_v35 = vpop.f32.mrb[0].mxu1 }
 0x300   : > { %v845_v36 = vpop.f32.mrb[1].mxu1 }
 0x301   : > { %v333_v37 = vpop.f32.mrb[2].mxu1 }
 0x302   : > { %v846_v38 = vpop.f32.mrb[3].mxu1 }
 0x307   : > { %v386_v39 = vpop.f32.mrb[4].mxu1 }
 0x308   : > { %v392_v40 = vmul.f32 0.35355338, %v386_v39  ;;  %v851_v41 = vpop.f32.mrb[5].mxu1 }
 0x309   : > { %v389_v42 = vpop.f32.mrb[6].mxu1 }
 0x30a   : > { %v852_v43 = vpop.f32.mrb[7].mxu1  ;;  %v393_v44 = vsel %vm272_vm2, %v392_v40, -inf }
 0x30b   : > { %394 = vmax.xlane.f32.xlu1 %v393_v44 }
 0x30f   : > { %v500_v45 = vpop.f32.mrb[8].mxu1 }
 0x310   : > { %v506_v46 = vmul.f32 0.35355338, %v500_v45  ;;  %v863_v47 = vpop.f32.mrb[9].mxu1  ;;  %v699_v45 = vld [vmem:[%s219_s7] sm:$0x7] }
 0x311   : > { %v503_v48 = vpop.f32.mrb[10].mxu1 }
 0x312   : > { %v507_v49 = vsel %vm272_vm2, %v506_v46, -inf  ;;  %v864_v50 = vpop.f32.mrb[11].mxu1 }
 0x313   : > { %508 = vmax.xlane.f32.xlu0 %v507_v49 }
 0x317   : > { %v611_v51 = vpop.f32.mrb[12].mxu1 }
 0x318   : > { %v617_v52 = vmul.f32 0.35355338, %v611_v51  ;;  %v875_v53 = vpop.f32.mrb[13].mxu1 }
 0x319   : > { %v614_v54 = vpop.f32.mrb[14].mxu1 }
 0x31a   : > { %v618_v55 = vsel %vm272_vm2, %v617_v52, -inf  ;;  %v876_v56 = vpop.f32.mrb[15].mxu1 }
 0x31b   : > { %619 = vmax.xlane.f32.xlu1 %v618_v55 }
 0x398   : > { %v395_v57 = vpop.xlane.xlu1 %394 }
 0x399   : > { %v396_v58 = vsub.f32 %v392_v40, %v395_v57 }
 0x39b   : > { %v397_v59 = vmul.f32 1.442695, %v396_v58 }
 0x39d   : > { %923 = vpow2.f32 %v397_v59 }
 0x3a0   : > { %v509_v60 = vpop.xlane.xlu0 %508 }
 0x3a1   : > { %v510_v61 = vsub.f32 %v506_v46, %v509_v60 }
 0x3a3   : > { %v511_v62 = vmul.f32 1.442695, %v510_v61 }
 0x3a5   : > { %925 = vpow2.f32 %v511_v62 }
 0x3a7   : > { %v924_v63 = vpop.eup %923 }
 0x3a8   : > { %v399_v1 = vsel %vm272_vm2, %v924_v63, 0.0  ;;  %v620_v5 = vpop.xlane.xlu1 %619 }
 0x3a9   : > { %400 = vadd.xlane.f32.xlu1 %v399_v1  ;;  %v621_v6 = vsub.f32 %v617_v52, %v620_v5 }
 0x3ab   : > { %v622_v7 = vmul.f32 1.442695, %v621_v6 }
 0x3ad   : > { %927 = vpow2.f32 %v622_v7 }
 0x3af   : > { %v926_v2 = vpop.eup %925 }
 0x3b0   : > { %v513_v3 = vsel %vm272_vm2, %v926_v2, 0.0 }
 0x3b1   : > { %514 = vadd.xlane.f32.xlu0 %v513_v3 }
 0x3b7   : > { %v928_v8 = vpop.eup %927 }
 0x3b8   : > { %v624_v9 = vsel %vm272_vm2, %v928_v8, 0.0 }
 0x3ba   : > { %519 = vrot.lane.b32.xlu1 %v811_v4, %s962_s24 }
 0x3c7   : > { %408 = vrot.lane.b32.xlu0 %v811_v4, %s961_s23 }
 0x3de   : > { %625 = vadd.xlane.f32.xlu1 %v624_v9 }
 0x3ef   : > { %630 = vrot.lane.b32.xlu1 %v811_v4, %s963_s25 }
 0x436   : > { %v401_v10 = vpop.xlane.xlu1 %400 }
 0x437   : > { %929 = vrcp.f32 %v401_v10 }
 0x43a   : > { %v520_v16 = vpop.permute.xlu1 %519 }
 0x43b   : > { %v525_v18 = vand.u32 %v520_v16, %v1040_v20 }
 0x43e   : > { %v515_v11 = vpop.xlane.xlu0 %514 }
 0x43f   : > { %931 = vrcp.f32 %v515_v11 }
 0x441   : > { %v930_v12 = vpop.eup %929 }
 0x442   : > { %v403_v13 = vmul.f32 %v930_v12, %v924_v63  ;;  %v409_v14 = vpop.permute.xlu0 %408 }
 0x443   : > { %v414_v15 = vand.u32 %v409_v14, %v1040_v20 }
 0x444   : > { %v404_v17 = vpack.c.bf16 %v403_v13, %v403_v13 }
 0x445   : > { %854 = vmatpush3.bf16.msra.mxu0 %v414_v15 }
 0x446   : > { %865 = vmatprep.subr.bf16.mxu0 %v959_v0 }
 0x448   : > { %856 = vmatmul.mubr.msk.bf16.vlgmr.msra.gmra.mrb[4].mxu0 %vm285_vm5, %v404_v17 }
 0x449   : > { %v932_v19 = vpop.eup %931  ;;  %866 = vmatpush3.bf16.msra.mxu0 %v525_v18  ;;  %867 = vmatprep.mubr.msk.bf16.mxu0 %vm960_vm0, %v959_v0 }
 0x44a   : > { %v517_v21 = vmul.f32 %v932_v19, %v926_v2  ;;  %877 = vmatprep.subr.bf16.mxu0 %v959_v0 }
 0x44c   : > { %v518_v22 = vpack.c.bf16 %v517_v21, %v517_v21 }
 0x450   : > { %868 = vmatmul.mubr.msk.bf16.vlgmr.msra.gmra.mrb[8].mxu0 %vm285_vm5, %v518_v22 }
 0x451   : > { %879 = vmatprep.mubr.msk.bf16.mxu0 %vm960_vm0, %v959_v0 }
 0x46b   : > { %v626_v23 = vpop.xlane.xlu1 %625 }
 0x46c   : > { %933 = vrcp.f32 %v626_v23 }
 0x46f   : > { %v631_v24 = vpop.permute.xlu1 %630 }
 0x470   : > { %v636_v25 = vand.u32 %v631_v24, %v1040_v20 }
 0x472   : > { %878 = vmatpush3.bf16.msra.mxu0 %v636_v25 }
 0x476   : > { %v934_v26 = vpop.eup %933 }
 0x477   : > { %v628_v27 = vmul.f32 %v934_v26, %v928_v8 }
 0x479   : > { %v629_v28 = vpack.c.bf16 %v628_v27, %v628_v27 }
 0x47b   : > { %880 = vmatmul.mubr.msk.bf16.vlgmr.msra.gmra.mrb[12].mxu0 %vm285_vm5, %v629_v28 }
 0x51b   : > { %v450_v29 = vpop.f32.mrb[4].mxu0 }
 0x51c   : > { %679 = vrot.lane.b32.xlu0 %v450_v29, %s965_s29  ;;  %v857_v30 = vpop.f32.mrb[5].mxu0 }
 0x51d   : > { %v453_v31 = vpop.f32.mrb[6].mxu0 }
 0x51e   : > { %v858_v32 = vpop.f32.mrb[7].mxu0 }
 0x523   : > { %v561_v33 = vpop.f32.mrb[8].mxu0 }
 0x524   : > { %683 = vrot.lane.b32.xlu1 %v561_v33, %s966_s30  ;;  %v869_v0 = vpop.f32.mrb[9].mxu0 }
 0x525   : > { %v564_v34 = vpop.f32.mrb[10].mxu0 }
 0x526   : > { %v870_v36 = vpop.f32.mrb[11].mxu0 }
 0x54e   : > { %v672_v20 = vpop.f32.mrb[12].mxu0 }
 0x54f   : > { %687 = vrot.lane.b32.xlu0 %v672_v20, %s967_s4  ;;  %v881_v37 = vpop.f32.mrb[13].mxu0 }
 0x550   : > { %v675_v38 = vpop.f32.mrb[14].mxu0 }
 0x551   : > { %v882_v39 = vpop.f32.mrb[15].mxu0 }
 0x58e   : > { %v680_v40 = vpop.permute.xlu0 %679 }
 0x58f   : > { %v690_v42 = vsel %vm224_vm1, %v1061_v35, %v680_v40 }
 0x596   : > { %v684_v41 = vpop.permute.xlu1 %683 }
 0x597   : > { %v692_v43 = vsel %vm691_vm6, %v690_v42, %v684_v41 }
 0x5c1   : > { %v688_v44 = vpop.permute.xlu0 %687 }
 0x5c2   : > { %v694_v46 = vsel %vm693_vm7, %v692_v43, %v688_v44 }
 0x5c3   : > { %v695_v47 = vpack.c.bf16 %v694_v46, %v694_v46 }
 0x5c5   : > { %v700_v48 = vsel %vm698_vm10, %v695_v47, %v699_v45 }
 0x5c6   : > { %701 = vst [vmem:[%s219_s7] sm:$0x7] %v700_v48 }
 0x5c7 PF: > { %s13_s14 = sadd.s32 1, %s957_s14   ;;  %s1105_s12 = smov %s953_s13 }
 0x5c8   : > { %p10_p5 = scmp.ge.s32.totalorder %s13_s14, 6   ;;  %s1106_s13 = smov %s1108_s15 }
 0x5ca   :  { %12 = sbr.rel (!%p10_p5) target bundleno = 2 (0x2), region = 68 }

// kernel: averager_forward.16
= control target key start
LH: loop header
LB: loop body
LE: loop exit
PB: predicated region body
PF: predicated region fallthrough
CT: control target
= control target key end

     0   :  { %vm52_vm0 = vcmask 261120   ;;  %vm132_vm1 = vcmask 254976   ;;  %vm129_vm2 = vcmask 257024   ;;  %s226_s1 = inlined_call_operand.vmem [shape: bf16[32,32], index: 1, kind: input, shape index: {}]   ;;  %s227_s0 = inlined_call_operand.vmem [shape: bf16[20,32], index: 0, kind: input, shape index: {}]   ;;  %s228_s3 = inlined_call_operand.vmem [shape: bf16[20,32], index: 3, kind: input, shape index: {}]   ;;  %s229_s2 = inlined_call_operand.vmem [shape: f32[1,32], index: 2, kind: input, shape index: {}]   ;;  %s230_s4 = inlined_call_operand.vmem [shape: bf16[20,32], index: 4, kind: output, shape index: {}]  }
   0x1   :  { %v167_v0 = vld [vmem:[%s226_s1] sm:$0xff]   ;;  %v168_v1 = vld [vmem:[%s226_s1 + $0x8] sm:$0xff]  }
   0x2   :  { %159 = vmatprep.subr.bf16.mxu0 %v167_v0  ;;  %v169_v2 = vld [vmem:[%s227_s0] sm:$0xff]   ;;  %v170_v3 = vld [vmem:[%s227_s0 + $0x8] ss:$0 sps:$4 sm:$0x33]  }
   0x3   :  { %160 = vmatpush3.bf16.msra.mxu0 %v167_v0  ;;  %163 = vmatprep.mubr.msk.bf16.mxu0 %vm52_vm0, %v169_v2  ;;  %v109_v4 = vld [vmem:[%s228_s3 + $0x8] sm:$0x3]  ;;  %v152_v5 = vld [vmem:[%s228_s3] sm:$0xff]  }
   0x4   :  { %161 = vmatprep.subr.bf16.mxu0 %v168_v1  ;;  %v138_v6 = vld [vmem:[%s229_s2] ss:$0 sm:$0xff]  ;;  %v112_v7 = vunpack.c.l.bf16 %v109_v4  ;;  %v153_v9 = vunpack.c.l.bf16 %v152_v5  ;;  %v154_v14 = vunpack.c.h.bf16 %v152_v5 }
   0x7   :  { %162 = vmatpush3.bf16.msra.mxu0 %v168_v1 }
   0xa   :  { %164 = vmatmul.mubr.msk.bf16.vlgmr.msra.gmra.mrb[0].mxu0 %vm52_vm0, %v170_v3 }
  0xdd   :  { %v165_v8 = vpop.f32.mrb[0].mxu0 }
  0xde   :  { %v102_v10 = vadd.f32 %v165_v8, %v138_v6  ;;  %v93_v11 = vpop.f32.mrb[1].mxu0 }
  0xdf   :  { %v94_v12 = vadd.f32 %v138_v6, %v93_v11  ;;  %v166_v13 = vpop.f32.mrb[2].mxu0 }
  0xe0   :  { %v115_v15 = vadd.f32 %v112_v7, %v102_v10  ;;  %v96_v16 = vpop.f32.mrb[3].mxu0 }
  0xe1   :  { %v113_v17 = vadd.f32 %v153_v9, %v94_v12  ;;  %v97_v18 = vadd.f32 %v138_v6, %v96_v16 }
  0xe2   :  { %v150_v19 = vpack.c.bf16 %v115_v15, %v115_v15 }
  0xe3   :  { %v148_v20 = vpack.c.bf16 %v113_v17, %v113_v17  ;;  %v114_v21 = vadd.f32 %v154_v14, %v97_v18 }
  0xe4   :  { %133 = vst.msk [vmem:[%s230_s4 + $0x8] sm:$0x3] %vm132_vm1, %v150_v19 }
  0xe5   :  { %130 = vst.msk [vmem:[%s230_s4] sm:$0xf] %vm129_vm2, %v148_v20  ;;  %v149_v22 = vpack.c.bf16 %v114_v21, %v114_v21 }
  0xe7   :  { %131 = vst.msk [vmem:[%s230_s4 + $0x4] sm:$0xf] %vm129_vm2, %v149_v22 }

// kernel: averager_forward.18
= control target key start
LH: loop header
LB: loop body
LE: loop exit
PB: predicated region body
PF: predicated region fallthrough
CT: control target
= control target key end

     0   :  { %vm68_vm0 = vcmask 523264   ;;  %vm148_vm1 = vcmask 254976   ;;  %vm145_vm2 = vcmask 257024   ;;  %s258_s1 = inlined_call_operand.vmem [shape: bf16[64,32], index: 1, kind: input, shape index: {}]   ;;  %s259_s0 = inlined_call_operand.vmem [shape: bf16[20,64], index: 0, kind: input, shape index: {}]   ;;  %s260_s3 = inlined_call_operand.vmem [shape: bf16[20,32], index: 3, kind: input, shape index: {}]   ;;  %s261_s2 = inlined_call_operand.vmem [shape: f32[1,32], index: 2, kind: input, shape index: {}]   ;;  %s262_s4 = inlined_call_operand.vmem [shape: bf16[20,32], index: 4, kind: output, shape index: {}]  }
   0x1   :  { %v191_v0 = vld [vmem:[%s258_s1] sm:$0xff]   ;;  %v192_v1 = vld [vmem:[%s258_s1 + $0x8] sm:$0xff]   ;;  %v193_v2 = vld [vmem:[%s258_s1 + $0x10] sm:$0xff]  }
   0x2   :  { %179 = vmatprep.subr.bf16.mxu0 %v191_v0  ;;  %v195_v3 = vld [vmem:[%s259_s0] sm:$0xff]   ;;  %v194_v4 = vld [vmem:[%s258_s1 + $0x18] sm:$0xff]   ;;  %v196_v5 = vld [vmem:[%s259_s0 + $0x8] ss:$0 sps:$4 sm:$0x33]  }
   0x3   :  { %180 = vmatpush3.bf16.msra.mxu0 %v191_v0  ;;  %187 = vmatprep.mubr.msk.bf16.mxu0 %vm68_vm0, %v195_v3  ;;  %v125_v6 = vld [vmem:[%s260_s3 + $0x8] sm:$0x3]  ;;  %v170_v7 = vld [vmem:[%s260_s3] sm:$0xff]  }
   0x4   :  { %181 = vmatprep.subr.bf16.mxu0 %v192_v1  ;;  %v154_v8 = vld [vmem:[%s261_s2] ss:$0 sm:$0xff]  ;;  %v128_v9 = vunpack.c.l.bf16 %v125_v6  ;;  %v171_v11 = vunpack.c.l.bf16 %v170_v7  ;;  %v172_v16 = vunpack.c.h.bf16 %v170_v7 }
   0x7   :  { %182 = vmatpush3.bf16.msra.mxu0 %v192_v1 }
   0x8   :  { %183 = vmatprep.subr.bf16.mxu0 %v193_v2 }
   0xb   :  { %184 = vmatpush3.bf16.msra.mxu0 %v193_v2 }
   0xc   :  { %185 = vmatprep.subr.bf16.mxu0 %v194_v4 }
   0xf   :  { %186 = vmatpush3.bf16.msra.mxu0 %v194_v4 }
  0x12   :  { %188 = vmatmul.mubr.msk.bf16.vlgmr.msra.gmra.mrb[0].mxu0 %vm68_vm0, %v196_v5 }
  0xe5   :  { %v189_v10 = vpop.f32.mrb[0].mxu0 }
  0xe6   :  { %v118_v12 = vadd.f32 %v189_v10, %v154_v8  ;;  %v109_v13 = vpop.f32.mrb[1].mxu0 }
  0xe7   :  { %v110_v14 = vadd.f32 %v154_v8, %v109_v13  ;;  %v190_v15 = vpop.f32.mrb[2].mxu0 }
  0xe8   :  { %v131_v17 = vadd.f32 %v128_v9, %v118_v12  ;;  %v112_v18 = vpop.f32.mrb[3].mxu0 }
  0xe9   :  { %v129_v19 = vadd.f32 %v171_v11, %v110_v14  ;;  %v113_v20 = vadd.f32 %v154_v8, %v112_v18 }
  0xea   :  { %v168_v21 = vpack.c.bf16 %v131_v17, %v131_v17 }
  0xeb   :  { %v166_v22 = vpack.c.bf16 %v129_v19, %v129_v19  ;;  %v130_v23 = vadd.f32 %v172_v16, %v113_v20 }
  0xec   :  { %149 = vst.msk [vmem:[%s262_s4 + $0x8] sm:$0x3] %vm148_vm1, %v168_v21 }
  0xed   :  { %146 = vst.msk [vmem:[%s262_s4] sm:$0xf] %vm145_vm2, %v166_v22  ;;  %v167_v24 = vpack.c.bf16 %v130_v23, %v130_v23 }
  0xef   :  { %147 = vst.msk [vmem:[%s262_s4 + $0x4] sm:$0xf] %vm145_vm2, %v167_v24 }

// kernel: averager_forward.17
= control target key start
LH: loop header
LB: loop body
LE: loop exit
PB: predicated region body
PF: predicated region fallthrough
CT: control target
= control target key end

     0   :  { %vm27_vm0 = vcmask 261120   ;;  %vm34_vm1 = vcmask 257024   ;;  %vm208_vm2 = vcmask 517120   ;;  %vm205_vm3 = vcmask 519168   ;;  %s334_s0 = inlined_call_operand.vmem [shape: bf16[20,32], index: 0, kind: input, shape index: {}]   ;;  %s335_s3 = inlined_call_operand.vmem [shape: bf16[32,64], index: 3, kind: input, shape index: {}]   ;;  %s336_s1 = inlined_call_operand.vmem [shape: f32[1,32], index: 1, kind: input, shape index: {}]   ;;  %s337_s2 = inlined_call_operand.vmem [shape: f32[1,32], index: 2, kind: input, shape index: {}]   ;;  %s338_s4 = inlined_call_operand.vmem [shape: f32[1,64], index: 4, kind: input, shape index: {}]   ;;  %s339_s5 = inlined_call_operand.vmem [shape: bf16[20,64], index: 5, kind: output, shape index: {}]  }
   0x1   :  { %v231_v0 = vld [vmem:[%s334_s0] sm:$0xff]   ;;  %v23_v1 = vld [vmem:[%s334_s0 + $0x8] sm:$0x3] }
   0x2   :  { %v232_v2 = vunpack.c.l.bf16 %v231_v0  ;;  %v26_v3 = vunpack.c.l.bf16 %v23_v1  ;;  %v233_v4 = vunpack.c.h.bf16 %v231_v0  ;;  %v246_v23 = vld [vmem:[%s335_s3] sm:$0xff]   ;;  %v247_v24 = vld [vmem:[%s335_s3 + $0x8] sm:$0xff]  }
   0x3   :  { %238 = vmatprep.subr.bf16.mxu0 %v246_v23  ;;  %v214_v36 = vld [vmem:[%s336_s1] ss:$0 sm:$0xff] }
   0x4   :  { %v28_v5 = vsel %vm27_vm0, %v232_v2, 0.0  ;;  %v35_v6 = vsel %vm34_vm1, %v26_v3, 0.0  ;;  %v31_v7 = vsel %vm27_vm0, %v233_v4, 0.0  ;;  %239 = vmatpush3.bf16.msra.mxu0 %v246_v23  ;;  %v215_v42 = vld [vmem:[%s337_s2] ss:$0 sm:$0xff] }
   0x5   :  { %29 = vadd.xlane.f32.xlu0 %v28_v5  ;;  %36 = vadd.xlane.f32.xlu1 %v35_v6  ;;  %v216_v50 = vld [vmem:[%s338_s4] ss:$0 sm:$0xff] }
   0x6   :  { %240 = vmatprep.subr.bf16.mxu0 %v247_v24 }
   0x8   :  { %241 = vmatpush3.bf16.msra.mxu0 %v247_v24 }
   0x9   :  { %32 = vadd.xlane.f32.xlu0 %v31_v7 }
  0x92   :  { %v30_v8 = vpop.xlane.xlu0 %29  ;;  %v37_v9 = vpop.xlane.xlu1 %36 }
  0x93   :  { %v39_v10 = vmul.f32 0.03125, %v30_v8  ;;  %v41_v11 = vmul.f32 0.03125, %v37_v9 }
  0x95   :  { %v42_v12 = vsub.f32 %v232_v2, %v39_v10  ;;  %v44_v13 = vsub.f32 %v26_v3, %v41_v11 }
  0x96   :  { %v33_v14 = vpop.xlane.xlu0 %32 }
  0x97   :  { %v40_v15 = vmul.f32 0.03125, %v33_v14  ;;  %v45_v16 = vmul.f32 %v42_v12, %v42_v12  ;;  %v47_v17 = vmul.f32 %v44_v13, %v44_v13 }
  0x99   :  { %v43_v18 = vsub.f32 %v233_v4, %v40_v15  ;;  %v48_v19 = vsel %vm27_vm0, %v45_v16, 0.0  ;;  %v54_v20 = vsel %vm34_vm1, %v47_v17, 0.0 }
  0x9a   :  { %49 = vadd.xlane.f32.xlu1 %v48_v19 }
  0x9b   :  { %v46_v21 = vmul.f32 %v43_v18, %v43_v18 }
  0x9d   :  { %v51_v22 = vsel %vm27_vm0, %v46_v21, 0.0 }
  0x9e   :  { %55 = vadd.xlane.f32.xlu1 %v54_v20  ;;  %52 = vadd.xlane.f32.xlu0 %v51_v22 }
 0x127   :  { %v50_v25 = vpop.xlane.xlu1 %49 }
 0x128   :  { %v57_v26 = vmul.f32 0.03125, %v50_v25 }
 0x12a   :  { %v60_v27 = vadd.f32 1e-05, %v57_v26 }
 0x12b   :  { %v56_v28 = vpop.xlane.xlu1 %55  ;;  %v53_v29 = vpop.xlane.xlu0 %52 }
 0x12c   :  { %248 = vrsqrt.f32 %v60_v27  ;;  %v59_v30 = vmul.f32 0.03125, %v56_v28  ;;  %v58_v31 = vmul.f32 0.03125, %v53_v29 }
 0x12e   :  { %v62_v32 = vadd.f32 1e-05, %v59_v30  ;;  %v61_v33 = vadd.f32 1e-05, %v58_v31 }
 0x130   :  { %250 = vrsqrt.f32 %v62_v32 }
 0x131   :  { %252 = vrsqrt.f32 %v61_v33 }
 0x136   :  { %v249_v34 = vpop.eup %248 }
 0x137   :  { %v66_v35 = vmul.f32 %v249_v34, %v42_v12 }
 0x139   :  { %v76_v41 = vmul.f32 %v214_v36, %v66_v35 }
 0x13a   :  { %v251_v37 = vpop.eup %250 }
 0x13b   :  { %v253_v38 = vpop.eup %252  ;;  %v68_v39 = vmul.f32 %v251_v37, %v44_v13  ;;  %v86_v46 = vadd.f32 %v215_v42, %v76_v41 }
 0x13c   :  { %v67_v40 = vmul.f32 %v253_v38, %v43_v18 }
 0x13d   :  { %v78_v43 = vmul.f32 %v214_v36, %v68_v39 }
 0x13e   :  { %v77_v44 = vmul.f32 %v214_v36, %v67_v40 }
 0x13f   :  { %v88_v45 = vadd.f32 %v215_v42, %v78_v43 }
 0x140   :  { %v87_v47 = vadd.f32 %v215_v42, %v77_v44 }
 0x141   :  { %v90_v48 = vpack.c.bf16 %v88_v45, %v88_v45 }
 0x142   :  { %v89_v49 = vpack.c.bf16 %v87_v47, %v86_v46 }
 0x144   :  { %242 = vmatprep.mubr.msk.bf16.mxu0 %vm27_vm0, %v89_v49 }
 0x145   :  { %243 = vmatmul.mubr.msk.bf16.vlgmr.msra.gmra.mrb[0].mxu0 %vm27_vm0, %v90_v48 }
 0x218   :  { %v244_v51 = vpop.f32.mrb[0].mxu0 }
 0x219   :  { %v163_v52 = vadd.f32 %v244_v51, %v216_v50  ;;  %v154_v53 = vpop.f32.mrb[1].mxu0 }
 0x21a   :  { %v155_v54 = vadd.f32 %v216_v50, %v154_v53  ;;  %v245_v55 = vpop.f32.mrb[2].mxu0 }
 0x21b   :  { %v223_v56 = vmul.f32 -1.702, %v163_v52  ;;  %v157_v57 = vpop.f32.mrb[3].mxu0 }
 0x21c   :  { %v221_v58 = vmul.f32 -1.702, %v155_v54  ;;  %v158_v59 = vadd.f32 %v216_v50, %v157_v57 }
 0x21d   :  { %v178_v60 = vmul.f32 1.442695, %v223_v56 }
 0x21e   :  { %v174_v61 = vmul.f32 1.442695, %v221_v58  ;;  %v222_v62 = vmul.f32 -1.702, %v158_v59 }
 0x21f   :  { %254 = vpow2.f32 %v178_v60 }
 0x220   :  { %256 = vpow2.f32 %v174_v61  ;;  %v176_v63 = vmul.f32 1.442695, %v222_v62 }
 0x222   :  { %258 = vpow2.f32 %v176_v63 }
 0x229   :  { %v255_v0 = vpop.eup %254 }
 0x22a   :  { %v257_v1 = vpop.eup %256  ;;  %v182_v2 = vadd.f32 1.0, %v255_v0 }
 0x22b   :  { %v180_v3 = vadd.f32 1.0, %v257_v1 }
 0x22c   :  { %v259_v4 = vpop.eup %258  ;;  %260 = vrcp.f32 %v182_v2 }
 0x22d   :  { %262 = vrcp.f32 %v180_v3  ;;  %v181_v5 = vadd.f32 1.0, %v259_v4 }
 0x22f   :  { %264 = vrcp.f32 %v181_v5 }
 0x236   :  { %v261_v6 = vpop.eup %260 }
 0x237   :  { %v263_v7 = vpop.eup %262  ;;  %v191_v8 = vmul.f32 %v261_v6, %v163_v52 }
 0x238   :  { %v189_v9 = vmul.f32 %v263_v7, %v155_v54 }
 0x239   :  { %v265_v10 = vpop.eup %264  ;;  %v229_v11 = vpack.c.bf16 %v191_v8, %v191_v8 }
 0x23a   :  { %v227_v12 = vpack.c.bf16 %v189_v9, %v189_v9  ;;  %v190_v13 = vmul.f32 %v265_v10, %v158_v59 }
 0x23b   :  { %209 = vst.msk [vmem:[%s339_s5 + $0x8] sm:$0x3] %vm208_vm2, %v229_v11 }
 0x23c   :  { %206 = vst.msk [vmem:[%s339_s5] sm:$0xf] %vm205_vm3, %v227_v12  ;;  %v228_v14 = vpack.c.bf16 %v190_v13, %v190_v13 }
 0x23e   :  { %207 = vst.msk [vmem:[%s339_s5 + $0x4] sm:$0xf] %vm205_vm3, %v228_v14 }

</bundles_post_ra>
